<compile_context>
chip_gen: v7x
topology: tpu7x:2x2x1
jax: 0.10.0
libtpu: 0.0.40
codegen_flags: <defaults>
</compile_context>

<pallas_src>
import functools
import math
from dataclasses import dataclass
from typing import Optional

import numpy as np
import jax
import jax.numpy as jnp
from jax.experimental import pallas as pl
from jax.experimental.pallas import tpu as pltpu


@dataclass(frozen=True)
class ModelArgs:
    dim: int = 32
    n_layers: int = 2
    n_heads: int = 4
    multiple_of: int = 32
    norm_eps: float = 1e-6
    dropout: float = 0.0               # p=0 -> dropout is identity (eval semantics)
    max_seq_len: int = 8
    use_causal_mask: bool = True
    item_vocab_size: int = 101
    cate_vocab_size: int = 23
    segment_vocab_size: int = 2
    embedding_dim: Optional[int] = None  # None == dim -> pre/post projectors are Identity
    item_ar_loss_weight: float = 0.0
    cate_ar_loss_weight: float = 0.0
    rank_loss_weight: float = 1.0


# ----------------------------- Pallas kernel --------------------------------


def _rmsnorm(x, w, eps):
    xf = x.astype(jnp.float32)
    ms = jnp.mean(xf * xf, axis=-1, keepdims=True)
    return xf * jax.lax.rsqrt(ms + eps) * w


def fused_forward_kernel(tgt_ref,                      # scalar prefetch: int32[B] target row
                         x_ref, rope_ref, mask_ref,    # per-batch activations / tables
                         in_ref, w2_ref, norms_ref, rank_ref,   # packed weights
                         logits_ref,                   # output (1, 1, 128) block
                         hsc_ref,                      # VMEM scratch (S, D)
                         *, n_layers, n_heads, head_dim, dim, hidden, eps):
    D = dim
    H = n_heads
    hd = head_dim
    attn_w = 4 * D + H * D             # [q | k | q_rot | k_rot | vo_h0..vo_hH-1]

    h = x_ref[0].astype(jnp.float32)               # (S, D) — one sequence per grid step
    mask = mask_ref[0]                             # (S, S) additive mask (causal / key-valid)
    ropec = rope_ref[:, 0:2 * D]                   # (S, 2D) cos table (q and k halves)
    ropes = rope_ref[:, 2 * D:4 * D]               # (S, 2D) sin table

    for l in range(n_layers):                      # static unroll (n_layers small)
        # ---- attention sub-block ----
        xn = _rmsnorm(h, norms_ref[2 * l:2 * l + 1, :], eps)
        # one fused MXU pass: q, k, pre-rotated q/k, and per-head (Wv@Wo)-folded values
        proj = jnp.dot(xn, in_ref[l, :, 0:attn_w],
                       preferred_element_type=jnp.float32)          # (S, attn_w)
        # full-width RoPE: rotate-half layout, sign/permutation folded into the weights
        qk_rot = proj[:, 0:2 * D] * ropec + proj[:, 2 * D:4 * D] * ropes   # (S, 2D)

        attn = jnp.zeros_like(h)
        for hh in range(H):                        # static unroll over heads
            q_h = qk_rot[:, hh * hd:(hh + 1) * hd]                  # (S, hd), scale pre-folded
            k_h = qk_rot[:, D + hh * hd:D + (hh + 1) * hd]
            s = jax.lax.dot_general(q_h, k_h, (((1,), (1,)), ((), ())),
                                    preferred_element_type=jnp.float32) + mask
            m = jnp.max(s, axis=-1, keepdims=True)
            e = jnp.exp(s - m)
            p = e * pl.reciprocal(jnp.sum(e, axis=-1, keepdims=True), approx=True)
            vo_h = proj[:, 4 * D + hh * D:4 * D + (hh + 1) * D]     # (S, D) = xn @ (Wv_h Wo_h)
            attn = attn + jnp.dot(p, vo_h, preferred_element_type=jnp.float32)
        h = h + attn

        # ---- SwiGLU feed-forward sub-block ----
        hn = _rmsnorm(h, norms_ref[2 * l + 1:2 * l + 2, :], eps)
        gu = jnp.dot(hn, in_ref[l, :, attn_w:attn_w + 2 * hidden],
                     preferred_element_type=jnp.float32)            # (S, 2*hidden) = [w1|w3]
        g = gu[:, 0:hidden]
        u = gu[:, hidden:2 * hidden]
        h = h + jnp.dot(g * jax.nn.sigmoid(g) * u, w2_ref[l],
                        preferred_element_type=jnp.float32)

    # ---- rank head on this sequence's target row (scalar-prefetched index) ----
    hsc_ref[...] = h
    idx = tgt_ref[pl.program_id(0)]
    row = hsc_ref[pl.ds(idx, 1), :]                                 # (1, D) dynamic row gather
    rown = _rmsnorm(row, norms_ref[2 * n_layers:2 * n_layers + 1, :], eps)
    hid = jnp.maximum(
        jnp.dot(rown, rank_ref[0:D, :], preferred_element_type=jnp.float32)
        + rank_ref[D:D + 1, :], 0.0)                                # (1, 4D)
    logit = (jnp.sum(hid * rank_ref[D + 1:D + 2, :], axis=-1, keepdims=True)
             + rank_ref[D + 2:D + 3, 0:1])                          # (1, 1)
    # lane-dense (unmasked) store: broadcast the logit across the 128-lane row
    logits_ref[...] = jnp.broadcast_to(logit.reshape(1, 1, 1), logits_ref.shape)


# ----------------------------- kernel wrapper --------------------------------


def run_fused_forward(cfg, prepped, tgt, x, rope, mask):
    B, S, D = x.shape
    H = cfg.n_heads
    hidden = prepped['w2'].shape[1]

    kern = functools.partial(
        fused_forward_kernel,
        n_layers=cfg.n_layers, n_heads=H, head_dim=D // H,
        dim=D, hidden=hidden, eps=cfg.norm_eps)

    grid_spec = pltpu.PrefetchScalarGridSpec(
        num_scalar_prefetch=1,
        grid=(B,),
        in_specs=[
            pl.BlockSpec((1, S, D), lambda b, tgt: (b, 0, 0)),            # x (per batch)
            pl.BlockSpec(rope.shape, lambda b, tgt: (0, 0)),              # rope table
            pl.BlockSpec((1, S, S), lambda b, tgt: (b, 0, 0)),            # additive mask
            pl.BlockSpec(prepped['in_slab'].shape, lambda b, tgt: (0, 0, 0)),
            pl.BlockSpec(prepped['w2'].shape, lambda b, tgt: (0, 0, 0)),
            pl.BlockSpec(prepped['norms'].shape, lambda b, tgt: (0, 0)),
            pl.BlockSpec(prepped['rank'].shape, lambda b, tgt: (0, 0)),
        ],
        out_specs=pl.BlockSpec((1, 1, 128), lambda b, tgt: (b, 0, 0)),
        scratch_shapes=[pltpu.VMEM((S, D), jnp.float32)],
    )

    return pl.pallas_call(
        kern,
        out_shape=jax.ShapeDtypeStruct((B, 1, 128), jnp.float32),
        grid_spec=grid_spec,
        compiler_params=pltpu.CompilerParams(dimension_semantics=("parallel",)),
    )(tgt, x, rope, mask, prepped['in_slab'], prepped['w2'],
      prepped['norms'], prepped['rank'])


# ------------------------ one-time weight preparation ------------------------


def _rope_perms(D, H):
    hd = D // H
    hd2 = hd // 2
    perm, rot_perm, rot_sign = [], [], []
    for h in range(H):
        base = h * hd
        evens = [base + 2 * p for p in range(hd2)]
        odds = [base + 2 * p + 1 for p in range(hd2)]
        perm += evens + odds                      # interleaved pairs -> [a | b] per head
        rot_perm += odds + evens                  # -> [b | a] per head
        rot_sign += [-1.0] * hd2 + [1.0] * hd2    # -> [-b | a] per head
    return (np.asarray(perm, np.int32), np.asarray(rot_perm, np.int32),
            np.asarray(rot_sign, np.float32))


def _rope_table(head_dim, max_len, n_heads, theta=10000.0):
    # precompute_freqs_cis -> full-width [cos|cos|sin|sin] tables in rotate-half layout.
    hd2 = head_dim // 2
    inv = 1.0 / theta ** (np.arange(0, head_dim, 2)[:hd2].astype(np.float32) / head_dim)
    t = np.arange(max_len, dtype=np.float32)
    ang = np.outer(t, inv)                                       # (max_len, hd/2)
    cos_full = np.tile(np.cos(ang), (1, 2 * n_heads))            # (max_len, D)
    sin_full = np.tile(np.sin(ang), (1, 2 * n_heads))
    return jnp.asarray(np.concatenate([cos_full, cos_full, sin_full, sin_full],
                                      axis=-1).astype(np.float32))   # (max_len, 4D)


def prepare_weights(cfg, params):
    """One-time packing (hoisted out of the per-step forward)."""
    D, L, H = cfg.dim, cfg.n_layers, cfg.n_heads
    hd = D // H
    scale = 1.0 / math.sqrt(hd)
    perm, rot_perm, rot_sign = _rope_perms(D, H)

    wq, wk, wv, wo = params['wq'], params['wk'], params['wv'], params['wo']
    wq_p = wq[:, :, perm] * scale                         # RoPE layout + score scale folded
    wk_p = wk[:, :, perm]
    wq_r = wq[:, :, rot_perm] * rot_sign * scale          # pre-rotated (half-swap, signed)
    wk_r = wk[:, :, rot_perm] * rot_sign
    # fold Wo head-wise into Wv:  Wvo_h = Wv[:, h] @ Wo[h, :]   (L, D, H*D)
    wvo = jnp.concatenate(
        [jnp.einsum('lij,ljk->lik', wv[:, :, h * hd:(h + 1) * hd],
                    wo[:, h * hd:(h + 1) * hd, :]) for h in range(H)], axis=-1)

    in_slab = jnp.concatenate([wq_p, wk_p, wq_r, wk_r, wvo,
                               params['w1'], params['w3']], axis=-1)   # (L, D, 4D+HD+2*hidden)

    norms = jnp.concatenate(
        [jnp.stack([params['attn_norm'], params['ffn_norm']], axis=1).reshape(2 * L, D),
         params['final_norm'].reshape(1, D)], axis=0)                  # (2L+1, D)

    rank_b2_row = jnp.zeros((1, 4 * D), jnp.float32).at[0, 0].set(params['rank_b2'])
    rank = jnp.concatenate([params['rank_w1'],
                            params['rank_b1'].reshape(1, 4 * D),
                            params['rank_w2t'].reshape(1, 4 * D),
                            rank_b2_row], axis=0)                      # (D+3, 4D)

    rope = _rope_table(hd, cfg.max_seq_len * 2, H)

    return {'item_emb': params['item_emb'], 'cate_emb': params['cate_emb'],
            'seg_emb': params['seg_emb'], 'in_slab': in_slab, 'w2': params['w2'],
            'norms': norms, 'rank': rank, 'rope': rope}


def init_params(cfg, key):
    D, L = cfg.dim, cfg.n_layers
    hidden = int(2 * (4 * D) / 3)
    hidden = cfg.multiple_of * ((hidden + cfg.multiple_of - 1) // cfg.multiple_of)
    keys = iter(jax.random.split(key, 32))
    nrm = lambda shape: 0.02 * jax.random.normal(next(keys), shape, jnp.float32)
    params = {
        'item_emb': nrm((cfg.item_vocab_size, D)),
        'cate_emb': nrm((cfg.cate_vocab_size, D)),
        'seg_emb': nrm((cfg.segment_vocab_size, D)),
        # per-layer weights, stored [in, out]
        'wq': nrm((L, D, D)), 'wk': nrm((L, D, D)),
        'wv': nrm((L, D, D)), 'wo': nrm((L, D, D)),
        'attn_norm': jnp.ones((L, D), jnp.float32),
        'ffn_norm': jnp.ones((L, D), jnp.float32),
        'w1': nrm((L, D, hidden)), 'w3': nrm((L, D, hidden)),
        'w2': nrm((L, hidden, D)),
        'final_norm': jnp.ones((D,), jnp.float32),
        'rank_w1': nrm((D, 4 * D)),
        'rank_b1': jnp.zeros((4 * D,), jnp.float32),
        'rank_w2t': nrm((4 * D,)),                 # stored transposed: logit = sum(h*w2t)+b2
        'rank_b2': jnp.zeros((), jnp.float32),
    }
    return params, hidden


# ----------------------------- forward (plain-JAX glue) ----------------------


def transformer_forward(cfg, prepped,
                        historical_item_ids, historical_cate_ids, historical_len,
                        target_item_id, target_cate_id, click_label,
                        item_ar_labels=None, cate_ar_labels=None):
    B = historical_item_ids.shape[0]

    padding = jnp.zeros_like(target_item_id)[:, None]
    input_item_ids = jnp.concatenate([historical_item_ids, padding], axis=1)
    input_cate_ids = jnp.concatenate([historical_cate_ids, padding], axis=1)
    barange = jnp.arange(B)
    input_item_ids = input_item_ids.at[barange, historical_len].set(target_item_id)
    input_cate_ids = input_cate_ids.at[barange, historical_len].set(target_cate_id)
    segment_ids = jnp.zeros_like(input_item_ids).at[barange, historical_len].set(1)
    S = input_item_ids.shape[1]

    # pre_projector is Identity (embedding_dim == dim); dropout p=0 is identity.
    x = (jnp.take(prepped['item_emb'], input_item_ids, axis=0)
         + jnp.take(prepped['cate_emb'], input_cate_ids, axis=0)
         + jnp.take(prepped['seg_emb'], segment_ids, axis=0)).astype(jnp.float32)  # (B,S,D)

    rope = prepped['rope'][:S]                                       # (S, 4D)

    if cfg.use_causal_mask:
        r = jnp.arange(S)
        causal = jnp.where(r[:, None] >= r[None, :], 0.0, -1e30).astype(jnp.float32)
        mask = jnp.broadcast_to(causal, (B, S, S))
    else:
        valid = jnp.arange(S)[None, :] < (historical_len + 1)[:, None]
        mask = jnp.broadcast_to(jnp.where(valid, 0.0, -1e30).astype(jnp.float32)[:, None, :],
                                (B, S, S))

    tgt = historical_len.astype(jnp.int32)                           # target row per sequence

    out = run_fused_forward(cfg, prepped, tgt, x, rope, mask)        # (B, 1, 128)
    logits = out[:, 0, 0]                                            # (B,)

    # TODO(synk): SampledARHead / FullARHead use SoftmaxLoss classes not defined in the
    # reference; with item/cate_ar_loss_weight == 0 the reference forward skips them too.
    item_ar_loss = jnp.float32(0.0)
    cate_ar_loss = jnp.float32(0.0)

    rank_outputs = jax.nn.sigmoid(logits)
    labels_f = click_label.astype(jnp.float32)
    lmask = (click_label == 0) | (click_label == 1)
    per = (jnp.maximum(logits, 0.0) - logits * labels_f
           + jnp.log1p(jnp.exp(-jnp.abs(logits))))                   # BCEWithLogits
    rank_loss = jnp.sum(jnp.where(lmask, per, 0.0)) / jnp.maximum(jnp.sum(lmask), 1)

    loss = (cfg.item_ar_loss_weight * item_ar_loss
            + cfg.cate_ar_loss_weight * cate_ar_loss
            + cfg.rank_loss_weight * rank_loss)
    return {'loss': loss, 'item_ar_loss': item_ar_loss, 'cate_ar_loss': cate_ar_loss,
            'rank_loss': rank_loss, 'rank_outputs': rank_outputs}


if __name__ == "__main__":
    cfg = ModelArgs()
    key = jax.random.PRNGKey(0)
    pkey, dkey = jax.random.split(key)
    params, hidden_dim = init_params(cfg, pkey)
    prepped = prepare_weights(cfg, params)     # one-time packing (hoisted out of the step)

    B = 2
    Lh = cfg.max_seq_len - 1                   # history length; seqlen = Lh + 1 = max_seq_len
    k1, k2, k3, k4, k5, k6 = jax.random.split(dkey, 6)
    historical_item_ids = jax.random.randint(k1, (B, Lh), 1, cfg.item_vocab_size)
    historical_cate_ids = jax.random.randint(k2, (B, Lh), 1, cfg.cate_vocab_size)
    historical_len = jnp.array([Lh, 4], dtype=jnp.int32)
    target_item_id = jax.random.randint(k3, (B,), 1, cfg.item_vocab_size)
    target_cate_id = jax.random.randint(k4, (B,), 1, cfg.cate_vocab_size)
    click_label = jnp.array([1, 0], dtype=jnp.int32)
    item_ar_labels = jax.random.randint(k5, (B, Lh), 1, cfg.item_vocab_size)
    cate_ar_labels = jax.random.randint(k6, (B, Lh), 1, cfg.cate_vocab_size)

    fwd = jax.jit(transformer_forward, static_argnums=(0,))
    out = fwd(cfg, prepped,
              historical_item_ids, historical_cate_ids, historical_len,
              target_item_id, target_cate_id, click_label,
              item_ar_labels, cate_ar_labels)
    jax.tree_util.tree_map(jax.block_until_ready, out)
    print("KERNEL_OK")
</pallas_src>

<mosaic_0001>
module attributes {stable_mosaic.version = 11 : i64} {
  func.func @fused_forward_kernel(%arg0: i32, %arg1: memref<2xi32, #tpu.memory_space<smem>>, %arg2: memref<1x8x32xf32, #tpu.memory_space<vmem>>, %arg3: memref<8x128xf32, #tpu.memory_space<vmem>>, %arg4: memref<1x8x8xf32, #tpu.memory_space<vmem>>, %arg5: memref<2x32x448xf32, #tpu.memory_space<vmem>>, %arg6: memref<2x96x32xf32, #tpu.memory_space<vmem>>, %arg7: memref<5x32xf32, #tpu.memory_space<vmem>>, %arg8: memref<35x128xf32, #tpu.memory_space<vmem>>, %arg9: memref<1x1x128xf32, #tpu.memory_space<vmem>>, %arg10: memref<8x32xf32, #tpu.memory_space<vmem>>) attributes {dimension_semantics = [#tpu.dimension_semantics<parallel>], iteration_bounds = array<i64: 2>, scalar_prefetch = 1 : i64, scratch_operands = 1 : i64, tpu.core_type = #tpu.core_type<tc>, window_params = [{transform_indices = @transform_0, window_bounds = array<i64: 1, 8, 32>}, {pipeline_mode = #tpu.pipeline_mode<synchronous>, transform_indices = @transform_1, window_bounds = array<i64: 8, 128>}, {transform_indices = @transform_2, window_bounds = array<i64: 1, 8, 8>}, {pipeline_mode = #tpu.pipeline_mode<synchronous>, transform_indices = @transform_3, window_bounds = array<i64: 2, 32, 448>}, {pipeline_mode = #tpu.pipeline_mode<synchronous>, transform_indices = @transform_4, window_bounds = array<i64: 2, 96, 32>}, {pipeline_mode = #tpu.pipeline_mode<synchronous>, transform_indices = @transform_5, window_bounds = array<i64: 5, 32>}, {pipeline_mode = #tpu.pipeline_mode<synchronous>, transform_indices = @transform_6, window_bounds = array<i64: 35, 128>}, {transform_indices = @transform_7, window_bounds = array<i64: 1, 1, 128>}]} {
    %c0 = arith.constant 0 : index
    %c0_0 = arith.constant 0 : index
    %c0_1 = arith.constant 0 : index
    %0 = vector.load %arg2[%c0, %c0_0, %c0_1] : memref<1x8x32xf32, #tpu.memory_space<vmem>>, vector<1x8x32xf32>
    %1 = vector.shape_cast %0 : vector<1x8x32xf32> to vector<8x32xf32>
    %c0_2 = arith.constant 0 : index
    %c0_3 = arith.constant 0 : index
    %c0_4 = arith.constant 0 : index
    %2 = vector.load %arg4[%c0_2, %c0_3, %c0_4] : memref<1x8x8xf32, #tpu.memory_space<vmem>>, vector<1x8x8xf32>
    %3 = vector.shape_cast %2 : vector<1x8x8xf32> to vector<8x8xf32>
    %c0_5 = arith.constant 0 : index
    %c0_6 = arith.constant 0 : index
    %4 = vector.load %arg3[%c0_5, %c0_6] : memref<8x128xf32, #tpu.memory_space<vmem>>, vector<8x64xf32>
    %c0_7 = arith.constant 0 : index
    %c64 = arith.constant 64 : index
    %5 = vector.load %arg3[%c0_7, %c64] : memref<8x128xf32, #tpu.memory_space<vmem>>, vector<8x64xf32>
    %c0_8 = arith.constant 0 : index
    %c0_9 = arith.constant 0 : index
    %6 = vector.load %arg7[%c0_8, %c0_9] : memref<5x32xf32, #tpu.memory_space<vmem>>, vector<1x32xf32>
    %7 = arith.mulf %1, %1 : vector<8x32xf32>
    %cst = arith.constant dense<0.000000e+00> : vector<8xf32>
    %8 = vector.multi_reduction <add>, %7, %cst [1] : vector<8x32xf32> to vector<8xf32>
    %9 = vector.shape_cast %8 : vector<8xf32> to vector<8x1xf32>
    %cst_10 = arith.constant 3.200000e+01 : f32
    %10 = vector.broadcast %cst_10 : f32 to vector<8x1xf32>
    %11 = arith.divf %9, %10 : vector<8x1xf32>
    %cst_11 = arith.constant 9.99999997E-7 : f32
    %12 = vector.broadcast %cst_11 : f32 to vector<8x1xf32>
    %13 = arith.addf %11, %12 : vector<8x1xf32>
    %14 = math.rsqrt %13 : vector<8x1xf32>
    %15 = vector.broadcast %14 : vector<8x1xf32> to vector<8x32xf32>
    %16 = arith.mulf %1, %15 : vector<8x32xf32>
    %17 = vector.broadcast %6 : vector<1x32xf32> to vector<8x32xf32>
    %18 = arith.mulf %16, %17 : vector<8x32xf32>
    %c0_12 = arith.constant 0 : index
    %c0_13 = arith.constant 0 : index
    %c0_14 = arith.constant 0 : index
    %19 = vector.load %arg5[%c0_12, %c0_13, %c0_14] : memref<2x32x448xf32, #tpu.memory_space<vmem>>, vector<1x32x256xf32>
    %20 = vector.shape_cast %19 : vector<1x32x256xf32> to vector<32x256xf32>
    %cst_15 = arith.constant dense<0.000000e+00> : vector<8x256xf32>
    %21 = tpu.matmul %18, %20, %cst_15 {dimension_numbers = #tpu.dot_dimension_numbers<[1], [0], [0], [1], [0, 0, 1, 1], [], []>} : vector<8x32xf32>, vector<32x256xf32>, vector<8x256xf32> -> vector<8x256xf32>
    %22 = vector.extract_strided_slice %21 {offsets = [0, 0], sizes = [8, 64], strides = [1, 1]} : vector<8x256xf32> to vector<8x64xf32>
    %23 = arith.mulf %22, %4 : vector<8x64xf32>
    %24 = vector.extract_strided_slice %21 {offsets = [0, 64], sizes = [8, 64], strides = [1, 1]} : vector<8x256xf32> to vector<8x64xf32>
    %25 = arith.mulf %24, %5 : vector<8x64xf32>
    %26 = arith.addf %23, %25 : vector<8x64xf32>
    %cst_16 = arith.constant 0.000000e+00 : f32
    %27 = vector.broadcast %cst_16 : f32 to vector<8x32xf32>
    %28 = vector.extract_strided_slice %26 {offsets = [0, 0], sizes = [8, 8], strides = [1, 1]} : vector<8x64xf32> to vector<8x8xf32>
    %29 = vector.extract_strided_slice %26 {offsets = [0, 32], sizes = [8, 8], strides = [1, 1]} : vector<8x64xf32> to vector<8x8xf32>
    %cst_17 = arith.constant dense<0.000000e+00> : vector<8x8xf32>
    %30 = tpu.matmul %28, %29, %cst_17 {dimension_numbers = #tpu.dot_dimension_numbers<[1], [1], [0], [0], [0, 0, 1, 0], [], []>} : vector<8x8xf32>, vector<8x8xf32>, vector<8x8xf32> -> vector<8x8xf32>
    %31 = arith.addf %30, %3 : vector<8x8xf32>
    %cst_18 = arith.constant dense<0xFF800000> : vector<8xf32>
    %32 = vector.multi_reduction <maximumf>, %31, %cst_18 [1] : vector<8x8xf32> to vector<8xf32>
    %33 = vector.shape_cast %32 : vector<8xf32> to vector<8x1xf32>
    %34 = vector.broadcast %33 : vector<8x1xf32> to vector<8x8xf32>
    %35 = arith.subf %31, %34 : vector<8x8xf32>
    %36 = math.exp %35 : vector<8x8xf32>
    %cst_19 = arith.constant dense<0.000000e+00> : vector<8xf32>
    %37 = vector.multi_reduction <add>, %36, %cst_19 [1] : vector<8x8xf32> to vector<8xf32>
    %38 = vector.shape_cast %37 : vector<8xf32> to vector<8x1xf32>
    %39 = tpu.reciprocal %38 {approx = true} : vector<8x1xf32> -> vector<8x1xf32>
    %40 = vector.broadcast %39 : vector<8x1xf32> to vector<8x8xf32>
    %41 = arith.mulf %36, %40 : vector<8x8xf32>
    %42 = vector.extract_strided_slice %21 {offsets = [0, 128], sizes = [8, 32], strides = [1, 1]} : vector<8x256xf32> to vector<8x32xf32>
    %cst_20 = arith.constant dense<0.000000e+00> : vector<8x32xf32>
    %43 = tpu.matmul %41, %42, %cst_20 {dimension_numbers = #tpu.dot_dimension_numbers<[1], [0], [0], [1], [0, 0, 1, 1], [], []>} : vector<8x8xf32>, vector<8x32xf32>, vector<8x32xf32> -> vector<8x32xf32>
    %44 = arith.addf %27, %43 : vector<8x32xf32>
    %45 = vector.extract_strided_slice %26 {offsets = [0, 8], sizes = [8, 8], strides = [1, 1]} : vector<8x64xf32> to vector<8x8xf32>
    %46 = vector.extract_strided_slice %26 {offsets = [0, 40], sizes = [8, 8], strides = [1, 1]} : vector<8x64xf32> to vector<8x8xf32>
    %cst_21 = arith.constant dense<0.000000e+00> : vector<8x8xf32>
    %47 = tpu.matmul %45, %46, %cst_21 {dimension_numbers = #tpu.dot_dimension_numbers<[1], [1], [0], [0], [0, 0, 1, 0], [], []>} : vector<8x8xf32>, vector<8x8xf32>, vector<8x8xf32> -> vector<8x8xf32>
    %48 = arith.addf %47, %3 : vector<8x8xf32>
    %cst_22 = arith.constant dense<0xFF800000> : vector<8xf32>
    %49 = vector.multi_reduction <maximumf>, %48, %cst_22 [1] : vector<8x8xf32> to vector<8xf32>
    %50 = vector.shape_cast %49 : vector<8xf32> to vector<8x1xf32>
    %51 = vector.broadcast %50 : vector<8x1xf32> to vector<8x8xf32>
    %52 = arith.subf %48, %51 : vector<8x8xf32>
    %53 = math.exp %52 : vector<8x8xf32>
    %cst_23 = arith.constant dense<0.000000e+00> : vector<8xf32>
    %54 = vector.multi_reduction <add>, %53, %cst_23 [1] : vector<8x8xf32> to vector<8xf32>
    %55 = vector.shape_cast %54 : vector<8xf32> to vector<8x1xf32>
    %56 = tpu.reciprocal %55 {approx = true} : vector<8x1xf32> -> vector<8x1xf32>
    %57 = vector.broadcast %56 : vector<8x1xf32> to vector<8x8xf32>
    %58 = arith.mulf %53, %57 : vector<8x8xf32>
    %59 = vector.extract_strided_slice %21 {offsets = [0, 160], sizes = [8, 32], strides = [1, 1]} : vector<8x256xf32> to vector<8x32xf32>
    %cst_24 = arith.constant dense<0.000000e+00> : vector<8x32xf32>
    %60 = tpu.matmul %58, %59, %cst_24 {dimension_numbers = #tpu.dot_dimension_numbers<[1], [0], [0], [1], [0, 0, 1, 1], [], []>} : vector<8x8xf32>, vector<8x32xf32>, vector<8x32xf32> -> vector<8x32xf32>
    %61 = arith.addf %44, %60 : vector<8x32xf32>
    %62 = vector.extract_strided_slice %26 {offsets = [0, 16], sizes = [8, 8], strides = [1, 1]} : vector<8x64xf32> to vector<8x8xf32>
    %63 = vector.extract_strided_slice %26 {offsets = [0, 48], sizes = [8, 8], strides = [1, 1]} : vector<8x64xf32> to vector<8x8xf32>
    %cst_25 = arith.constant dense<0.000000e+00> : vector<8x8xf32>
    %64 = tpu.matmul %62, %63, %cst_25 {dimension_numbers = #tpu.dot_dimension_numbers<[1], [1], [0], [0], [0, 0, 1, 0], [], []>} : vector<8x8xf32>, vector<8x8xf32>, vector<8x8xf32> -> vector<8x8xf32>
    %65 = arith.addf %64, %3 : vector<8x8xf32>
    %cst_26 = arith.constant dense<0xFF800000> : vector<8xf32>
    %66 = vector.multi_reduction <maximumf>, %65, %cst_26 [1] : vector<8x8xf32> to vector<8xf32>
    %67 = vector.shape_cast %66 : vector<8xf32> to vector<8x1xf32>
    %68 = vector.broadcast %67 : vector<8x1xf32> to vector<8x8xf32>
    %69 = arith.subf %65, %68 : vector<8x8xf32>
    %70 = math.exp %69 : vector<8x8xf32>
    %cst_27 = arith.constant dense<0.000000e+00> : vector<8xf32>
    %71 = vector.multi_reduction <add>, %70, %cst_27 [1] : vector<8x8xf32> to vector<8xf32>
    %72 = vector.shape_cast %71 : vector<8xf32> to vector<8x1xf32>
    %73 = tpu.reciprocal %72 {approx = true} : vector<8x1xf32> -> vector<8x1xf32>
    %74 = vector.broadcast %73 : vector<8x1xf32> to vector<8x8xf32>
    %75 = arith.mulf %70, %74 : vector<8x8xf32>
    %76 = vector.extract_strided_slice %21 {offsets = [0, 192], sizes = [8, 32], strides = [1, 1]} : vector<8x256xf32> to vector<8x32xf32>
    %cst_28 = arith.constant dense<0.000000e+00> : vector<8x32xf32>
    %77 = tpu.matmul %75, %76, %cst_28 {dimension_numbers = #tpu.dot_dimension_numbers<[1], [0], [0], [1], [0, 0, 1, 1], [], []>} : vector<8x8xf32>, vector<8x32xf32>, vector<8x32xf32> -> vector<8x32xf32>
    %78 = arith.addf %61, %77 : vector<8x32xf32>
    %79 = vector.extract_strided_slice %26 {offsets = [0, 24], sizes = [8, 8], strides = [1, 1]} : vector<8x64xf32> to vector<8x8xf32>
    %80 = vector.extract_strided_slice %26 {offsets = [0, 56], sizes = [8, 8], strides = [1, 1]} : vector<8x64xf32> to vector<8x8xf32>
    %cst_29 = arith.constant dense<0.000000e+00> : vector<8x8xf32>
    %81 = tpu.matmul %79, %80, %cst_29 {dimension_numbers = #tpu.dot_dimension_numbers<[1], [1], [0], [0], [0, 0, 1, 0], [], []>} : vector<8x8xf32>, vector<8x8xf32>, vector<8x8xf32> -> vector<8x8xf32>
    %82 = arith.addf %81, %3 : vector<8x8xf32>
    %cst_30 = arith.constant dense<0xFF800000> : vector<8xf32>
    %83 = vector.multi_reduction <maximumf>, %82, %cst_30 [1] : vector<8x8xf32> to vector<8xf32>
    %84 = vector.shape_cast %83 : vector<8xf32> to vector<8x1xf32>
    %85 = vector.broadcast %84 : vector<8x1xf32> to vector<8x8xf32>
    %86 = arith.subf %82, %85 : vector<8x8xf32>
    %87 = math.exp %86 : vector<8x8xf32>
    %cst_31 = arith.constant dense<0.000000e+00> : vector<8xf32>
    %88 = vector.multi_reduction <add>, %87, %cst_31 [1] : vector<8x8xf32> to vector<8xf32>
    %89 = vector.shape_cast %88 : vector<8xf32> to vector<8x1xf32>
    %90 = tpu.reciprocal %89 {approx = true} : vector<8x1xf32> -> vector<8x1xf32>
    %91 = vector.broadcast %90 : vector<8x1xf32> to vector<8x8xf32>
    %92 = arith.mulf %87, %91 : vector<8x8xf32>
    %93 = vector.extract_strided_slice %21 {offsets = [0, 224], sizes = [8, 32], strides = [1, 1]} : vector<8x256xf32> to vector<8x32xf32>
    %cst_32 = arith.constant dense<0.000000e+00> : vector<8x32xf32>
    %94 = tpu.matmul %92, %93, %cst_32 {dimension_numbers = #tpu.dot_dimension_numbers<[1], [0], [0], [1], [0, 0, 1, 1], [], []>} : vector<8x8xf32>, vector<8x32xf32>, vector<8x32xf32> -> vector<8x32xf32>
    %95 = arith.addf %78, %94 : vector<8x32xf32>
    %96 = arith.addf %1, %95 : vector<8x32xf32>
    %c1 = arith.constant 1 : index
    %c0_33 = arith.constant 0 : index
    %97 = vector.load %arg7[%c1, %c0_33] : memref<5x32xf32, #tpu.memory_space<vmem>>, vector<1x32xf32>
    %98 = arith.mulf %96, %96 : vector<8x32xf32>
    %cst_34 = arith.constant dense<0.000000e+00> : vector<8xf32>
    %99 = vector.multi_reduction <add>, %98, %cst_34 [1] : vector<8x32xf32> to vector<8xf32>
    %100 = vector.shape_cast %99 : vector<8xf32> to vector<8x1xf32>
    %cst_35 = arith.constant 3.200000e+01 : f32
    %101 = vector.broadcast %cst_35 : f32 to vector<8x1xf32>
    %102 = arith.divf %100, %101 : vector<8x1xf32>
    %cst_36 = arith.constant 9.99999997E-7 : f32
    %103 = vector.broadcast %cst_36 : f32 to vector<8x1xf32>
    %104 = arith.addf %102, %103 : vector<8x1xf32>
    %105 = math.rsqrt %104 : vector<8x1xf32>
    %106 = vector.broadcast %105 : vector<8x1xf32> to vector<8x32xf32>
    %107 = arith.mulf %96, %106 : vector<8x32xf32>
    %108 = vector.broadcast %97 : vector<1x32xf32> to vector<8x32xf32>
    %109 = arith.mulf %107, %108 : vector<8x32xf32>
    %c0_37 = arith.constant 0 : index
    %c0_38 = arith.constant 0 : index
    %c256 = arith.constant 256 : index
    %110 = vector.load %arg5[%c0_37, %c0_38, %c256] : memref<2x32x448xf32, #tpu.memory_space<vmem>>, vector<1x32x192xf32>
    %111 = vector.shape_cast %110 : vector<1x32x192xf32> to vector<32x192xf32>
    %cst_39 = arith.constant dense<0.000000e+00> : vector<8x192xf32>
    %112 = tpu.matmul %109, %111, %cst_39 {dimension_numbers = #tpu.dot_dimension_numbers<[1], [0], [0], [1], [0, 0, 1, 1], [], []>} : vector<8x32xf32>, vector<32x192xf32>, vector<8x192xf32> -> vector<8x192xf32>
    %113 = vector.extract_strided_slice %112 {offsets = [0, 0], sizes = [8, 96], strides = [1, 1]} : vector<8x192xf32> to vector<8x96xf32>
    %114 = vector.extract_strided_slice %112 {offsets = [0, 96], sizes = [8, 96], strides = [1, 1]} : vector<8x192xf32> to vector<8x96xf32>
    %115 = arith.negf %113 : vector<8x96xf32>
    %116 = math.exp %115 : vector<8x96xf32>
    %cst_40 = arith.constant 1.000000e+00 : f32
    %117 = vector.broadcast %cst_40 : f32 to vector<8x96xf32>
    %118 = arith.addf %117, %116 : vector<8x96xf32>
    %119 = arith.divf %117, %118 : vector<8x96xf32>
    %120 = arith.mulf %113, %119 : vector<8x96xf32>
    %121 = arith.mulf %120, %114 : vector<8x96xf32>
    %c0_41 = arith.constant 0 : index
    %c0_42 = arith.constant 0 : index
    %c0_43 = arith.constant 0 : index
    %122 = vector.load %arg6[%c0_41, %c0_42, %c0_43] : memref<2x96x32xf32, #tpu.memory_space<vmem>>, vector<1x96x32xf32>
    %123 = vector.shape_cast %122 : vector<1x96x32xf32> to vector<96x32xf32>
    %cst_44 = arith.constant dense<0.000000e+00> : vector<8x32xf32>
    %124 = tpu.matmul %121, %123, %cst_44 {dimension_numbers = #tpu.dot_dimension_numbers<[1], [0], [0], [1], [0, 0, 1, 1], [], []>} : vector<8x96xf32>, vector<96x32xf32>, vector<8x32xf32> -> vector<8x32xf32>
    %125 = arith.addf %96, %124 : vector<8x32xf32>
    %c2 = arith.constant 2 : index
    %c0_45 = arith.constant 0 : index
    %126 = vector.load %arg7[%c2, %c0_45] : memref<5x32xf32, #tpu.memory_space<vmem>>, vector<1x32xf32>
    %127 = arith.mulf %125, %125 : vector<8x32xf32>
    %cst_46 = arith.constant dense<0.000000e+00> : vector<8xf32>
    %128 = vector.multi_reduction <add>, %127, %cst_46 [1] : vector<8x32xf32> to vector<8xf32>
    %129 = vector.shape_cast %128 : vector<8xf32> to vector<8x1xf32>
    %cst_47 = arith.constant 3.200000e+01 : f32
    %130 = vector.broadcast %cst_47 : f32 to vector<8x1xf32>
    %131 = arith.divf %129, %130 : vector<8x1xf32>
    %cst_48 = arith.constant 9.99999997E-7 : f32
    %132 = vector.broadcast %cst_48 : f32 to vector<8x1xf32>
    %133 = arith.addf %131, %132 : vector<8x1xf32>
    %134 = math.rsqrt %133 : vector<8x1xf32>
    %135 = vector.broadcast %134 : vector<8x1xf32> to vector<8x32xf32>
    %136 = arith.mulf %125, %135 : vector<8x32xf32>
    %137 = vector.broadcast %126 : vector<1x32xf32> to vector<8x32xf32>
    %138 = arith.mulf %136, %137 : vector<8x32xf32>
    %c1_49 = arith.constant 1 : index
    %c0_50 = arith.constant 0 : index
    %c0_51 = arith.constant 0 : index
    %139 = vector.load %arg5[%c1_49, %c0_50, %c0_51] : memref<2x32x448xf32, #tpu.memory_space<vmem>>, vector<1x32x256xf32>
    %140 = vector.shape_cast %139 : vector<1x32x256xf32> to vector<32x256xf32>
    %cst_52 = arith.constant dense<0.000000e+00> : vector<8x256xf32>
    %141 = tpu.matmul %138, %140, %cst_52 {dimension_numbers = #tpu.dot_dimension_numbers<[1], [0], [0], [1], [0, 0, 1, 1], [], []>} : vector<8x32xf32>, vector<32x256xf32>, vector<8x256xf32> -> vector<8x256xf32>
    %142 = vector.extract_strided_slice %141 {offsets = [0, 0], sizes = [8, 64], strides = [1, 1]} : vector<8x256xf32> to vector<8x64xf32>
    %143 = arith.mulf %142, %4 : vector<8x64xf32>
    %144 = vector.extract_strided_slice %141 {offsets = [0, 64], sizes = [8, 64], strides = [1, 1]} : vector<8x256xf32> to vector<8x64xf32>
    %145 = arith.mulf %144, %5 : vector<8x64xf32>
    %146 = arith.addf %143, %145 : vector<8x64xf32>
    %cst_53 = arith.constant 0.000000e+00 : f32
    %147 = vector.broadcast %cst_53 : f32 to vector<8x32xf32>
    %148 = vector.extract_strided_slice %146 {offsets = [0, 0], sizes = [8, 8], strides = [1, 1]} : vector<8x64xf32> to vector<8x8xf32>
    %149 = vector.extract_strided_slice %146 {offsets = [0, 32], sizes = [8, 8], strides = [1, 1]} : vector<8x64xf32> to vector<8x8xf32>
    %cst_54 = arith.constant dense<0.000000e+00> : vector<8x8xf32>
    %150 = tpu.matmul %148, %149, %cst_54 {dimension_numbers = #tpu.dot_dimension_numbers<[1], [1], [0], [0], [0, 0, 1, 0], [], []>} : vector<8x8xf32>, vector<8x8xf32>, vector<8x8xf32> -> vector<8x8xf32>
    %151 = arith.addf %150, %3 : vector<8x8xf32>
    %cst_55 = arith.constant dense<0xFF800000> : vector<8xf32>
    %152 = vector.multi_reduction <maximumf>, %151, %cst_55 [1] : vector<8x8xf32> to vector<8xf32>
    %153 = vector.shape_cast %152 : vector<8xf32> to vector<8x1xf32>
    %154 = vector.broadcast %153 : vector<8x1xf32> to vector<8x8xf32>
    %155 = arith.subf %151, %154 : vector<8x8xf32>
    %156 = math.exp %155 : vector<8x8xf32>
    %cst_56 = arith.constant dense<0.000000e+00> : vector<8xf32>
    %157 = vector.multi_reduction <add>, %156, %cst_56 [1] : vector<8x8xf32> to vector<8xf32>
    %158 = vector.shape_cast %157 : vector<8xf32> to vector<8x1xf32>
    %159 = tpu.reciprocal %158 {approx = true} : vector<8x1xf32> -> vector<8x1xf32>
    %160 = vector.broadcast %159 : vector<8x1xf32> to vector<8x8xf32>
    %161 = arith.mulf %156, %160 : vector<8x8xf32>
    %162 = vector.extract_strided_slice %141 {offsets = [0, 128], sizes = [8, 32], strides = [1, 1]} : vector<8x256xf32> to vector<8x32xf32>
    %cst_57 = arith.constant dense<0.000000e+00> : vector<8x32xf32>
    %163 = tpu.matmul %161, %162, %cst_57 {dimension_numbers = #tpu.dot_dimension_numbers<[1], [0], [0], [1], [0, 0, 1, 1], [], []>} : vector<8x8xf32>, vector<8x32xf32>, vector<8x32xf32> -> vector<8x32xf32>
    %164 = arith.addf %147, %163 : vector<8x32xf32>
    %165 = vector.extract_strided_slice %146 {offsets = [0, 8], sizes = [8, 8], strides = [1, 1]} : vector<8x64xf32> to vector<8x8xf32>
    %166 = vector.extract_strided_slice %146 {offsets = [0, 40], sizes = [8, 8], strides = [1, 1]} : vector<8x64xf32> to vector<8x8xf32>
    %cst_58 = arith.constant dense<0.000000e+00> : vector<8x8xf32>
    %167 = tpu.matmul %165, %166, %cst_58 {dimension_numbers = #tpu.dot_dimension_numbers<[1], [1], [0], [0], [0, 0, 1, 0], [], []>} : vector<8x8xf32>, vector<8x8xf32>, vector<8x8xf32> -> vector<8x8xf32>
    %168 = arith.addf %167, %3 : vector<8x8xf32>
    %cst_59 = arith.constant dense<0xFF800000> : vector<8xf32>
    %169 = vector.multi_reduction <maximumf>, %168, %cst_59 [1] : vector<8x8xf32> to vector<8xf32>
    %170 = vector.shape_cast %169 : vector<8xf32> to vector<8x1xf32>
    %171 = vector.broadcast %170 : vector<8x1xf32> to vector<8x8xf32>
    %172 = arith.subf %168, %171 : vector<8x8xf32>
    %173 = math.exp %172 : vector<8x8xf32>
    %cst_60 = arith.constant dense<0.000000e+00> : vector<8xf32>
    %174 = vector.multi_reduction <add>, %173, %cst_60 [1] : vector<8x8xf32> to vector<8xf32>
    %175 = vector.shape_cast %174 : vector<8xf32> to vector<8x1xf32>
    %176 = tpu.reciprocal %175 {approx = true} : vector<8x1xf32> -> vector<8x1xf32>
    %177 = vector.broadcast %176 : vector<8x1xf32> to vector<8x8xf32>
    %178 = arith.mulf %173, %177 : vector<8x8xf32>
    %179 = vector.extract_strided_slice %141 {offsets = [0, 160], sizes = [8, 32], strides = [1, 1]} : vector<8x256xf32> to vector<8x32xf32>
    %cst_61 = arith.constant dense<0.000000e+00> : vector<8x32xf32>
    %180 = tpu.matmul %178, %179, %cst_61 {dimension_numbers = #tpu.dot_dimension_numbers<[1], [0], [0], [1], [0, 0, 1, 1], [], []>} : vector<8x8xf32>, vector<8x32xf32>, vector<8x32xf32> -> vector<8x32xf32>
    %181 = arith.addf %164, %180 : vector<8x32xf32>
    %182 = vector.extract_strided_slice %146 {offsets = [0, 16], sizes = [8, 8], strides = [1, 1]} : vector<8x64xf32> to vector<8x8xf32>
    %183 = vector.extract_strided_slice %146 {offsets = [0, 48], sizes = [8, 8], strides = [1, 1]} : vector<8x64xf32> to vector<8x8xf32>
    %cst_62 = arith.constant dense<0.000000e+00> : vector<8x8xf32>
    %184 = tpu.matmul %182, %183, %cst_62 {dimension_numbers = #tpu.dot_dimension_numbers<[1], [1], [0], [0], [0, 0, 1, 0], [], []>} : vector<8x8xf32>, vector<8x8xf32>, vector<8x8xf32> -> vector<8x8xf32>
    %185 = arith.addf %184, %3 : vector<8x8xf32>
    %cst_63 = arith.constant dense<0xFF800000> : vector<8xf32>
    %186 = vector.multi_reduction <maximumf>, %185, %cst_63 [1] : vector<8x8xf32> to vector<8xf32>
    %187 = vector.shape_cast %186 : vector<8xf32> to vector<8x1xf32>
    %188 = vector.broadcast %187 : vector<8x1xf32> to vector<8x8xf32>
    %189 = arith.subf %185, %188 : vector<8x8xf32>
    %190 = math.exp %189 : vector<8x8xf32>
    %cst_64 = arith.constant dense<0.000000e+00> : vector<8xf32>
    %191 = vector.multi_reduction <add>, %190, %cst_64 [1] : vector<8x8xf32> to vector<8xf32>
    %192 = vector.shape_cast %191 : vector<8xf32> to vector<8x1xf32>
    %193 = tpu.reciprocal %192 {approx = true} : vector<8x1xf32> -> vector<8x1xf32>
    %194 = vector.broadcast %193 : vector<8x1xf32> to vector<8x8xf32>
    %195 = arith.mulf %190, %194 : vector<8x8xf32>
    %196 = vector.extract_strided_slice %141 {offsets = [0, 192], sizes = [8, 32], strides = [1, 1]} : vector<8x256xf32> to vector<8x32xf32>
    %cst_65 = arith.constant dense<0.000000e+00> : vector<8x32xf32>
    %197 = tpu.matmul %195, %196, %cst_65 {dimension_numbers = #tpu.dot_dimension_numbers<[1], [0], [0], [1], [0, 0, 1, 1], [], []>} : vector<8x8xf32>, vector<8x32xf32>, vector<8x32xf32> -> vector<8x32xf32>
    %198 = arith.addf %181, %197 : vector<8x32xf32>
    %199 = vector.extract_strided_slice %146 {offsets = [0, 24], sizes = [8, 8], strides = [1, 1]} : vector<8x64xf32> to vector<8x8xf32>
    %200 = vector.extract_strided_slice %146 {offsets = [0, 56], sizes = [8, 8], strides = [1, 1]} : vector<8x64xf32> to vector<8x8xf32>
    %cst_66 = arith.constant dense<0.000000e+00> : vector<8x8xf32>
    %201 = tpu.matmul %199, %200, %cst_66 {dimension_numbers = #tpu.dot_dimension_numbers<[1], [1], [0], [0], [0, 0, 1, 0], [], []>} : vector<8x8xf32>, vector<8x8xf32>, vector<8x8xf32> -> vector<8x8xf32>
    %202 = arith.addf %201, %3 : vector<8x8xf32>
    %cst_67 = arith.constant dense<0xFF800000> : vector<8xf32>
    %203 = vector.multi_reduction <maximumf>, %202, %cst_67 [1] : vector<8x8xf32> to vector<8xf32>
    %204 = vector.shape_cast %203 : vector<8xf32> to vector<8x1xf32>
    %205 = vector.broadcast %204 : vector<8x1xf32> to vector<8x8xf32>
    %206 = arith.subf %202, %205 : vector<8x8xf32>
    %207 = math.exp %206 : vector<8x8xf32>
    %cst_68 = arith.constant dense<0.000000e+00> : vector<8xf32>
    %208 = vector.multi_reduction <add>, %207, %cst_68 [1] : vector<8x8xf32> to vector<8xf32>
    %209 = vector.shape_cast %208 : vector<8xf32> to vector<8x1xf32>
    %210 = tpu.reciprocal %209 {approx = true} : vector<8x1xf32> -> vector<8x1xf32>
    %211 = vector.broadcast %210 : vector<8x1xf32> to vector<8x8xf32>
    %212 = arith.mulf %207, %211 : vector<8x8xf32>
    %213 = vector.extract_strided_slice %141 {offsets = [0, 224], sizes = [8, 32], strides = [1, 1]} : vector<8x256xf32> to vector<8x32xf32>
    %cst_69 = arith.constant dense<0.000000e+00> : vector<8x32xf32>
    %214 = tpu.matmul %212, %213, %cst_69 {dimension_numbers = #tpu.dot_dimension_numbers<[1], [0], [0], [1], [0, 0, 1, 1], [], []>} : vector<8x8xf32>, vector<8x32xf32>, vector<8x32xf32> -> vector<8x32xf32>
    %215 = arith.addf %198, %214 : vector<8x32xf32>
    %216 = arith.addf %125, %215 : vector<8x32xf32>
    %c3 = arith.constant 3 : index
    %c0_70 = arith.constant 0 : index
    %217 = vector.load %arg7[%c3, %c0_70] : memref<5x32xf32, #tpu.memory_space<vmem>>, vector<1x32xf32>
    %218 = arith.mulf %216, %216 : vector<8x32xf32>
    %cst_71 = arith.constant dense<0.000000e+00> : vector<8xf32>
    %219 = vector.multi_reduction <add>, %218, %cst_71 [1] : vector<8x32xf32> to vector<8xf32>
    %220 = vector.shape_cast %219 : vector<8xf32> to vector<8x1xf32>
    %cst_72 = arith.constant 3.200000e+01 : f32
    %221 = vector.broadcast %cst_72 : f32 to vector<8x1xf32>
    %222 = arith.divf %220, %221 : vector<8x1xf32>
    %cst_73 = arith.constant 9.99999997E-7 : f32
    %223 = vector.broadcast %cst_73 : f32 to vector<8x1xf32>
    %224 = arith.addf %222, %223 : vector<8x1xf32>
    %225 = math.rsqrt %224 : vector<8x1xf32>
    %226 = vector.broadcast %225 : vector<8x1xf32> to vector<8x32xf32>
    %227 = arith.mulf %216, %226 : vector<8x32xf32>
    %228 = vector.broadcast %217 : vector<1x32xf32> to vector<8x32xf32>
    %229 = arith.mulf %227, %228 : vector<8x32xf32>
    %c1_74 = arith.constant 1 : index
    %c0_75 = arith.constant 0 : index
    %c256_76 = arith.constant 256 : index
    %230 = vector.load %arg5[%c1_74, %c0_75, %c256_76] : memref<2x32x448xf32, #tpu.memory_space<vmem>>, vector<1x32x192xf32>
    %231 = vector.shape_cast %230 : vector<1x32x192xf32> to vector<32x192xf32>
    %cst_77 = arith.constant dense<0.000000e+00> : vector<8x192xf32>
    %232 = tpu.matmul %229, %231, %cst_77 {dimension_numbers = #tpu.dot_dimension_numbers<[1], [0], [0], [1], [0, 0, 1, 1], [], []>} : vector<8x32xf32>, vector<32x192xf32>, vector<8x192xf32> -> vector<8x192xf32>
    %233 = vector.extract_strided_slice %232 {offsets = [0, 0], sizes = [8, 96], strides = [1, 1]} : vector<8x192xf32> to vector<8x96xf32>
    %234 = vector.extract_strided_slice %232 {offsets = [0, 96], sizes = [8, 96], strides = [1, 1]} : vector<8x192xf32> to vector<8x96xf32>
    %235 = arith.negf %233 : vector<8x96xf32>
    %236 = math.exp %235 : vector<8x96xf32>
    %cst_78 = arith.constant 1.000000e+00 : f32
    %237 = vector.broadcast %cst_78 : f32 to vector<8x96xf32>
    %238 = arith.addf %237, %236 : vector<8x96xf32>
    %239 = arith.divf %237, %238 : vector<8x96xf32>
    %240 = arith.mulf %233, %239 : vector<8x96xf32>
    %241 = arith.mulf %240, %234 : vector<8x96xf32>
    %c1_79 = arith.constant 1 : index
    %c0_80 = arith.constant 0 : index
    %c0_81 = arith.constant 0 : index
    %242 = vector.load %arg6[%c1_79, %c0_80, %c0_81] : memref<2x96x32xf32, #tpu.memory_space<vmem>>, vector<1x96x32xf32>
    %243 = vector.shape_cast %242 : vector<1x96x32xf32> to vector<96x32xf32>
    %cst_82 = arith.constant dense<0.000000e+00> : vector<8x32xf32>
    %244 = tpu.matmul %241, %243, %cst_82 {dimension_numbers = #tpu.dot_dimension_numbers<[1], [0], [0], [1], [0, 0, 1, 1], [], []>} : vector<8x96xf32>, vector<96x32xf32>, vector<8x32xf32> -> vector<8x32xf32>
    %245 = arith.addf %216, %244 : vector<8x32xf32>
    %c0_83 = arith.constant 0 : index
    %c0_84 = arith.constant 0 : index
    %246 = vector.load %arg10[%c0_83, %c0_84] : memref<8x32xf32, #tpu.memory_space<vmem>>, vector<8x32xf32>
    tpu.vector_store %arg10[%c0_83, %c0_84], %245 {strides = array<i32>} : memref<8x32xf32, #tpu.memory_space<vmem>>, vector<8x32xf32>,
    %247 = arith.index_cast %arg0 : i32 to index
    %248 = memref.load %arg1[%247] : memref<2xi32, #tpu.memory_space<smem>>
    %249 = arith.index_cast %248 : i32 to index
    %c0_85 = arith.constant 0 : index
    %250 = vector.load %arg10[%249, %c0_85] : memref<8x32xf32, #tpu.memory_space<vmem>>, vector<1x32xf32>
    %c4 = arith.constant 4 : index
    %c0_86 = arith.constant 0 : index
    %251 = vector.load %arg7[%c4, %c0_86] : memref<5x32xf32, #tpu.memory_space<vmem>>, vector<1x32xf32>
    %252 = arith.mulf %250, %250 : vector<1x32xf32>
    %cst_87 = arith.constant dense<0.000000e+00> : vector<1xf32>
    %253 = vector.multi_reduction <add>, %252, %cst_87 [1] : vector<1x32xf32> to vector<1xf32>
    %254 = vector.shape_cast %253 : vector<1xf32> to vector<1x1xf32>
    %cst_88 = arith.constant 3.200000e+01 : f32
    %255 = vector.broadcast %cst_88 : f32 to vector<1x1xf32>
    %256 = arith.divf %254, %255 : vector<1x1xf32>
    %cst_89 = arith.constant 9.99999997E-7 : f32
    %257 = vector.broadcast %cst_89 : f32 to vector<1x1xf32>
    %258 = arith.addf %256, %257 : vector<1x1xf32>
    %259 = math.rsqrt %258 : vector<1x1xf32>
    %260 = vector.broadcast %259 : vector<1x1xf32> to vector<1x32xf32>
    %261 = arith.mulf %250, %260 : vector<1x32xf32>
    %262 = arith.mulf %261, %251 : vector<1x32xf32>
    %c0_90 = arith.constant 0 : index
    %c0_91 = arith.constant 0 : index
    %263 = vector.load %arg8[%c0_90, %c0_91] : memref<35x128xf32, #tpu.memory_space<vmem>>, vector<32x128xf32>
    %cst_92 = arith.constant dense<0.000000e+00> : vector<1x128xf32>
    %264 = tpu.matmul %262, %263, %cst_92 {dimension_numbers = #tpu.dot_dimension_numbers<[1], [0], [0], [1], [0, 0, 1, 1], [], []>} : vector<1x32xf32>, vector<32x128xf32>, vector<1x128xf32> -> vector<1x128xf32>
    %c32 = arith.constant 32 : index
    %c0_93 = arith.constant 0 : index
    %265 = vector.load %arg8[%c32, %c0_93] : memref<35x128xf32, #tpu.memory_space<vmem>>, vector<1x128xf32>
    %266 = arith.addf %264, %265 : vector<1x128xf32>
    %cst_94 = arith.constant 0.000000e+00 : f32
    %267 = vector.broadcast %cst_94 : f32 to vector<1x128xf32>
    %268 = arith.maximumf %266, %267 : vector<1x128xf32>
    %c33 = arith.constant 33 : index
    %c0_95 = arith.constant 0 : index
    %269 = vector.load %arg8[%c33, %c0_95] : memref<35x128xf32, #tpu.memory_space<vmem>>, vector<1x128xf32>
    %270 = arith.mulf %268, %269 : vector<1x128xf32>
    %cst_96 = arith.constant dense<0.000000e+00> : vector<1xf32>
    %271 = vector.multi_reduction <add>, %270, %cst_96 [1] : vector<1x128xf32> to vector<1xf32>
    %272 = vector.shape_cast %271 : vector<1xf32> to vector<1x1xf32>
    %c34 = arith.constant 34 : index
    %c0_97 = arith.constant 0 : index
    %273 = vector.load %arg8[%c34, %c0_97] : memref<35x128xf32, #tpu.memory_space<vmem>>, vector<1x1xf32>
    %274 = arith.addf %272, %273 : vector<1x1xf32>
    %275 = vector.shape_cast %274 : vector<1x1xf32> to vector<1x1x1xf32>
    %276 = vector.shape_cast %275 : vector<1x1x1xf32> to vector<1x1x1xf32>
    %277 = vector.broadcast %276 : vector<1x1x1xf32> to vector<1x1x128xf32>
    %c0_98 = arith.constant 0 : index
    %c0_99 = arith.constant 0 : index
    %c0_100 = arith.constant 0 : index
    %278 = vector.load %arg9[%c0_98, %c0_99, %c0_100] : memref<1x1x128xf32, #tpu.memory_space<vmem>>, vector<1x1x128xf32>
    tpu.vector_store %arg9[%c0_98, %c0_99, %c0_100], %277 {strides = array<i32>} : memref<1x1x128xf32, #tpu.memory_space<vmem>>, vector<1x1x128xf32>,
    return
  }
  func.func @transform_0(%arg0: i32, %arg1: memref<2xi32, #tpu.memory_space<smem>>) -> (i32, i32, i32) {
    %c0_i32 = arith.constant 0 : i32
    %c0_i32_0 = arith.constant 0 : i32
    %c0_i32_1 = arith.constant 0 : i32
    return %arg0, %c0_i32, %c0_i32_0 : i32, i32, i32
  }
  func.func @transform_1(%arg0: i32, %arg1: memref<2xi32, #tpu.memory_space<smem>>) -> (i32, i32) {
    %c0_i32 = arith.constant 0 : i32
    %c0_i32_0 = arith.constant 0 : i32
    %c0_i32_1 = arith.constant 0 : i32
    return %c0_i32, %c0_i32_0 : i32, i32
  }
  func.func @transform_2(%arg0: i32, %arg1: memref<2xi32, #tpu.memory_space<smem>>) -> (i32, i32, i32) {
    %c0_i32 = arith.constant 0 : i32
    %c0_i32_0 = arith.constant 0 : i32
    %c0_i32_1 = arith.constant 0 : i32
    return %arg0, %c0_i32, %c0_i32_0 : i32, i32, i32
  }
  func.func @transform_3(%arg0: i32, %arg1: memref<2xi32, #tpu.memory_space<smem>>) -> (i32, i32, i32) {
    %c0_i32 = arith.constant 0 : i32
    %c0_i32_0 = arith.constant 0 : i32
    %c0_i32_1 = arith.constant 0 : i32
    %c0_i32_2 = arith.constant 0 : i32
    return %c0_i32, %c0_i32_0, %c0_i32_1 : i32, i32, i32
  }
  func.func @transform_4(%arg0: i32, %arg1: memref<2xi32, #tpu.memory_space<smem>>) -> (i32, i32, i32) {
    %c0_i32 = arith.constant 0 : i32
    %c0_i32_0 = arith.constant 0 : i32
    %c0_i32_1 = arith.constant 0 : i32
    %c0_i32_2 = arith.constant 0 : i32
    return %c0_i32, %c0_i32_0, %c0_i32_1 : i32, i32, i32
  }
  func.func @transform_5(%arg0: i32, %arg1: memref<2xi32, #tpu.memory_space<smem>>) -> (i32, i32) {
    %c0_i32 = arith.constant 0 : i32
    %c0_i32_0 = arith.constant 0 : i32
    %c0_i32_1 = arith.constant 0 : i32
    return %c0_i32, %c0_i32_0 : i32, i32
  }
  func.func @transform_6(%arg0: i32, %arg1: memref<2xi32, #tpu.memory_space<smem>>) -> (i32, i32) {
    %c0_i32 = arith.constant 0 : i32
    %c0_i32_0 = arith.constant 0 : i32
    %c0_i32_1 = arith.constant 0 : i32
    return %c0_i32, %c0_i32_0 : i32, i32
  }
  func.func @transform_7(%arg0: i32, %arg1: memref<2xi32, #tpu.memory_space<smem>>) -> (i32, i32, i32) {
    %c0_i32 = arith.constant 0 : i32
    %c0_i32_0 = arith.constant 0 : i32
    %c0_i32_1 = arith.constant 0 : i32
    return %arg0, %c0_i32, %c0_i32_0 : i32, i32, i32
  }
}

</mosaic_0001>

<bundles_post_ra>
// kernel: transformer_forward.1
= control target key start
LH: loop header
LB: loop body
LE: loop exit
PB: predicated region body
PF: predicated region fallthrough
CT: control target
= control target key end

     0   :  { %s3349_s0 = inlined_call_operand.vmem [shape: s32[2], index: 0, kind: input, shape index: {}]   ;;  %s3350_s1 = inlined_call_operand.vmem [shape: f32[2,8,32], index: 1, kind: input, shape index: {}]   ;;  %s3351_s2 = inlined_call_operand.vmem [shape: f32[8,128], index: 2, kind: input, shape index: {}]   ;;  %s3352_s3 = inlined_call_operand.vmem [shape: f32[2,8,8], index: 3, kind: input, shape index: {}]   ;;  %s3353_s4 = inlined_call_operand.vmem [shape: f32[2,32,448], index: 4, kind: input, shape index: {}]   ;;  %s3354_s5 = inlined_call_operand.vmem [shape: f32[2,96,32], index: 5, kind: input, shape index: {}]   ;;  %s3355_s6 = inlined_call_operand.vmem [shape: f32[5,32], index: 6, kind: input, shape index: {}]   ;;  %s3356_s7 = inlined_call_operand.vmem [shape: f32[35,128], index: 7, kind: input, shape index: {}]   ;;  %s3357_s8 = inlined_call_operand.vmem [shape: f32[2,1,128], index: 8, kind: output, shape index: {}]  }
   0x1   :  { %s13_s29 = sshll.u32 %s3349_s0, 4  ;;  %s14_s29 = int_to_ptr.vmem [resolvable:$true] %s13_s29 }
   0x2   :  { %s2823_s30 = scalar_lea.vmem %s14_s29, 16  ;;  %p2828_p1 = scmp.lt.s32.totalorder %s14_s29, %s14_s29 }
   0x3   :  { %p2824_p0 = scmp.ne.s32.totalorder %s14_s29, %s2823_s30  ;;  %p2829_p2 = scmp.lt.s32.totalorder %s2823_s30, %s2823_s30 }
   0x5   :  { %p2830_p3 = por %p2829_p2, %p2828_p1 }
   0x7   :  { %p2831_p4 = pnand %p2830_p3, %p2824_p0 }
   0x9   :  { %2834 = shalt.err (!%p2831_p4)  }
   0xa   :  { %s2845_s9 = smov [#allocation4]  }
   0xb   :  { %16 = dma.vmem_to_smem %s14_s29, 16, %s2845_s9, [#allocation3] }
   0xc   :  { %2839 = dma.done.wait [#allocation3], 16 }
   0xd   :  { %2840 = vsyncadd [#allocation3], 4294967280 }
   0xe   :  { %18 = sfence }
   0xf   :  { %s2907_s10 = smov 0  }
  0x10 LB: > { %s2913_s0 = sadd.s32 4294967295, %s2843_s10   ;;  %p2397_p5 = scmp.ge.s32.totalorder %s2843_s10, 1  ;;  %s2843_s10 = sphi %s2907_s10, %s24_s10  }
  0x11   : > { %p252_p6 = scmp.lt.s32.totalorder %s2843_s10, 3 }
  0x13   : > { %p253_p7 = pnand %p2397_p5, %p252_p6 }
  0x14   : > { %p285_p8 = scmp.lt.s32.totalorder (!%p253_p7), %s2913_s0, 1  ;;  %vm301_vm0 = vcmask (!%p253_p7), 261120   ;;  %v316_v3 = vld [vmem:[%s3353_s4 + $0x8] sm:$0xff] (!%p253_p7)  ;;  %v315_v5 = vld [vmem:[%s3353_s4] sm:$0xff] (!%p253_p7)  ;;  %v2846_v10 = vmov (!%p253_p7), 0.0   ;;  %s2847_s17 = smov (!%p253_p7), 64  }
  0x15   : > { %256 = sbr.rel (%p253_p7) target bundleno = 5912 (0x1718), region = 48  ;;  %v318_v4 = vld [vmem:[%s3353_s4 + $0x28] sm:$0xff] (!%p253_p7)  ;;  %v317_v7 = vld [vmem:[%s3353_s4 + $0x20] sm:$0xff] (!%p253_p7)  ;;  %390 = vmatprep.mubr.f32.mxu0 (!%p253_p7), %v2846_v10  ;;  %2535 = vmatprep.subr.mxu1 (!%p253_p7), %v2846_v10  ;;  %vm2848_vm1 = vmmov (!%p253_p7), 0   ;;  %s2849_s18 = smov (!%p253_p7), 88   ;;  %vm406_vm2 = vcmask (!%p253_p7), 64512  }
  0x16   : > { %v2675_v6 = vpack.c.bf16 (!%p253_p7), %v318_v4, %v316_v3  ;;  %v320_v8 = vld [vmem:[%s3353_s4 + $0x48] sm:$0xff] (!%p253_p7)  ;;  %v2677_v11 = vpack.c.bf16 (!%p253_p7), %v317_v7, %v315_v5  ;;  %v319_v13 = vld [vmem:[%s3353_s4 + $0x40] sm:$0xff] (!%p253_p7)  ;;  %2537 = vmatprep.mubr.msk.f32.mxu1 (!%p253_p7), %vm2848_vm1, %v2846_v10  ;;  %s2850_s19 = smov (!%p253_p7), 120   ;;  %s2851_s23 = smov (!%p253_p7), 96   ;;  %vm1188_vm3 = vcmask (!%p253_p7), 785408   ;;  %vm2231_vm4 = vcmask (!%p253_p7), 253952  }
  0x17   : > { %v322_v9 = vld [vmem:[%s3353_s4 + $0x68] sm:$0xff] (!%p253_p7)  ;;  %v321_v14 = vld [vmem:[%s3353_s4 + $0x60] sm:$0xff] (!%p253_p7)  ;;  %s2852_s24 = smov (!%p253_p7), 80   ;;  %s2853_s25 = smov (!%p253_p7), 112   ;;  %vm2321_vm5 = vcmask (!%p253_p7), 1040384  }
  0x18   : > { %v2679_v12 = vpack.c.bf16 (!%p253_p7), %v322_v9, %v320_v8  ;;  %2676 = vmatprep.subr.bf16.mxu0 (!%p253_p7), %v2675_v6  ;;  %v2681_v15 = vpack.c.bf16 (!%p253_p7), %v321_v14, %v319_v13  ;;  %v2400_v20 = vld [vmem:[%s3355_s6] ss:$0 sm:$0xff] (!%p253_p7)  ;;  %s2854_s26 = smov (!%p253_p7), 72   ;;  %s2856_s27 = smov (!%p253_p7), 32  }
  0x19   : > { %2678 = vmatpush1.bf16.msra.mxu0 (!%p253_p7), %v2677_v11  ;;  %v2967_v23 = vld [vmem:[%s3351_s2] sm:$0xff] (!%p253_p7) }
  0x1a   : > { %2680 = vmatprep.subr.bf16.mxu0 (!%p253_p7), %v2679_v12 }
  0x1c   : > { %s2919_s11 = scalar_select %p285_p8, %s2913_s0, 1 }
  0x1d   : > { %2682 = vmatpush1.bf16.msra.mxu0 %v2681_v15 }
  0x1e   : > { %s2398_s12 = sshll.u32 %s2919_s11, 3  ;;  %2530 = vmatprep.subr.mxu0 %v2846_v10 }
  0x1f   : > { %s288_s15 = scalar_lea.vmem %s3350_s1, %s2398_s12  ;;  %s292_s22 = scalar_lea.vmem %s3352_s3, %s2398_s12 }
  0x20   : > { %v2927_v0 = vld [vmem:[%s288_s15] sm:$0xff]  ;;  %s2855_s12 = smov 104  }
  0x21   : > { %v300_v1 = vmul.f32 %v2927_v0, %v2927_v0  ;;  %v2991_v31 = vld [vmem:[%s292_s22] sm:$0xff] }
  0x23   : > { %v302_v2 = vsel %vm301_vm0, %v300_v1, 0.0 }
  0x24   : > { %303 = vadd.xlane.f32.xlu0 %v302_v2 }
  0xb1   : > { %v304_v16 = vpop.xlane.xlu0 %303 }
  0xb2   : > { %v306_v17 = vmul.f32 0.03125, %v304_v16 }
  0xb4   : > { %v307_v18 = vadd.f32 1e-06, %v306_v17 }
  0xb6   : > { %2773 = vrsqrt.f32 %v307_v18 }
  0xc0   : > { %v2774_v19 = vpop.eup %2773 }
  0xc1   : > { %v309_v21 = vmul.f32 %v2774_v19, %v2927_v0 }
  0xc3   : > { %v314_v22 = vmul.f32 %v2400_v20, %v309_v21 }
  0xc5   : > { %2401 = vmatmul.mubr.msk.f32.vlgmr.msra.gmra.mrb[0].mxu0 %vm301_vm0, %v314_v22 }
  0xc6   : > { %2532 = vmatprep.mubr.msk.f32.mxu0 %vm2848_vm1, %v2846_v10 }
 0x198   : > { %v392_v24 = vpop.f32.mrb[0].mxu0 }
 0x199   : > { %v397_v25 = vmul.f32 %v392_v24, %v2967_v23  ;;  %v2970_v26 = vpop.f32.mrb[1].mxu0 }
 0x19b   : > { %399 = vrot.lane.b32.xlu0 %v397_v25, %s2847_s17 }
 0x20d   : > { %v400_v27 = vpop.permute.xlu0 %399 }
 0x20e   : > { %v402_v28 = vadd.f32 %v400_v27, %v397_v25 }
 0x210   : > { %494 = vrot.lane.b32.xlu1 %v402_v28, %s2849_s18 }
 0x214   : > { %492 = vrot.lane.b32.xlu1 %v402_v28, %s2850_s19 }
 0x282   : > { %v495_v29 = vpop.permute.xlu1 %494 }
 0x283   : > { %2536 = vmatpush3.xpose.msk.msra.mxu1 %vm406_vm2, %v495_v29 }
 0x284   : > { %2545 = vmatprep.subr.mxu1 %v2846_v10 }
 0x286   : > { %v493_v30 = vpop.permute.xlu1 %492 }
 0x287   : > { %2538 = vmatmul.mubr.msk.f32.vlgmr.msra.gmra.mrb[0].mxu1 %vm406_vm2, %v493_v30 }
 0x288   : > { %2546 = vmatpush3.msra.mxu1 %v2970_v26  ;;  %2547 = vmatprep.mubr.msk.f32.mxu1 %vm2848_vm1, %v2846_v10 }
 0x289   : > { %2555 = vmatprep.subr.mxu1 %v2846_v10 }
 0x35a   : > { %v566_v32 = vpop.f32.mrb[0].mxu1 }
 0x35b   : > { %v567_v33 = vadd.f32 %v566_v32, %v2991_v31  ;;  %v2539_v34 = vpop.f32.mrb[1].mxu1 }
 0x35d   : > { %v570_v35 = vsel %vm406_vm2, %v567_v33, -inf }
 0x35e   : > { %571 = vmax.xlane.f32.xlu1 %v570_v35 }
 0x36f   : > { %404 = vrot.lane.b32.xlu1 %v402_v28, %s2851_s23 }
 0x373   : > { %733 = vrot.lane.b32.xlu1 %v402_v28, %s2852_s24 }
 0x377   : > { %731 = vrot.lane.b32.xlu1 %v402_v28, %s2853_s25 }
 0x37b   : > { %899 = vrot.lane.b32.xlu1 %v402_v28, %s2854_s26 }
 0x37f   : > { %897 = vrot.lane.b32.xlu1 %v402_v28, %s2855_s12 }
 0x3eb   : > { %v572_v36 = vpop.xlane.xlu1 %571 }
 0x3ec   : > { %v573_v37 = vsub.f32 %v567_v33, %v572_v36 }
 0x3ee   : > { %v574_v38 = vmul.f32 1.442695, %v573_v37 }
 0x3ef   : > { %v405_v39 = vpop.permute.xlu1 %404 }
 0x3f0   : > { %2775 = vpow2.f32 %v574_v38  ;;  %2531 = vmatpush3.xpose.msk.msra.mxu0 %vm406_vm2, %v405_v39 }
 0x3f1   : > { %2540 = vmatprep.subr.mxu0 %v2846_v10 }
 0x3f3   : > { %2533 = vmatmul.mubr.msk.f32.vlgmr.msra.gmra.mrb[2].mxu0 %vm406_vm2, %v402_v28  ;;  %v734_v43 = vpop.permute.xlu1 %733 }
 0x3f4   : > { %2542 = vmatprep.mubr.msk.f32.mxu0 %vm2848_vm1, %v2846_v10 }
 0x3f7   : > { %v732_v45 = vpop.permute.xlu1 %731 }
 0x3fa   : > { %v2776_v40 = vpop.eup %2775 }
 0x3fb   : > { %v576_v41 = vsel %vm406_vm2, %v2776_v40, 0.0  ;;  %v900_v48 = vpop.permute.xlu1 %899 }
 0x3fc   : > { %577 = vadd.xlane.f32.xlu0 %v576_v41 }
 0x3ff   : > { %v898_v49 = vpop.permute.xlu1 %897 }
 0x412   : > { %582 = vrot.lane.b32.xlu0 %v2970_v26, %s2851_s23 }
 0x489   : > { %v578_v42 = vpop.xlane.xlu0 %577 }
 0x48a   : > { %2777 = vrcp.f32 %v578_v42  ;;  %v1079_v42 = vld [vmem:[%s3353_s4 + $0x18] sm:$0xff] }
 0x48d   : > { %v583_v44 = vpop.permute.xlu0 %582 }
 0x48e   : > { %2541 = vmatpush3.msra.mxu0 %v583_v44 }
 0x48f   : > { %2550 = vmatprep.subr.mxu0 %v2846_v10 }
 0x494   : > { %v2778_v46 = vpop.eup %2777 }
 0x495   : > { %v580_v47 = vmul.f32 %v2778_v46, %v2776_v40 }
 0x497   : > { %2543 = vmatmul.mubr.msk.f32.vlgmr.msra.gmra.mrb[4].mxu0 %vm406_vm2, %v580_v47  ;;  %v1083_v47 = vld [vmem:[%s3353_s4 + $0x58] sm:$0xff] }
 0x498   : > { %2551 = vmatpush3.xpose.msk.msra.mxu0 %vm406_vm2, %v734_v43  ;;  %2552 = vmatprep.mubr.msk.f32.mxu0 %vm2848_vm1, %v2846_v10  ;;  %v1081_v43 = vld [vmem:[%s3353_s4 + $0x38] sm:$0xff] }
 0x499   : > { %2560 = vmatprep.subr.mxu0 %v2846_v10  ;;  %v2683_v44 = vpack.c.bf16 %v1081_v43, %v1079_v42  ;;  %v2426_v42 = vld [vmem:[%s3353_s4 + $0xe8] sm:$0xff] }
 0x49b   : > { %2553 = vmatmul.mubr.msk.f32.vlgmr.msra.gmra.mrb[6].mxu0 %vm406_vm2, %v732_v45  ;;  %v1080_v45 = vld [vmem:[%s3353_s4 + $0x30] sm:$0xff] }
 0x49c   : > { %2561 = vmatpush3.xpose.msk.msra.mxu0 %vm406_vm2, %v900_v48  ;;  %2562 = vmatprep.mubr.msk.f32.mxu0 %vm2848_vm1, %v2846_v10  ;;  %v1085_v48 = vld [vmem:[%s3353_s4 + $0x78] sm:$0xff] }
 0x49d   : > { %2684 = vmatprep.subr.bf16.mxu0 %v2683_v44  ;;  %v2423_v44 = vld [vmem:[%s3353_s4 + $0xc0] sm:$0xff] }
 0x49f   : > { %2563 = vmatmul.mubr.msk.f32.vlgmr.msra.gmra.mrb[8].mxu0 %vm406_vm2, %v898_v49  ;;  %v2687_v49 = vpack.c.bf16 %v1085_v48, %v1083_v47 }
 0x4a0   : > { %1153 = vmatprep.mubr.f32.mxu0 %v2846_v10 }
 0x4c6   : > { %v477_v50 = vpop.f32.mrb[2].mxu0 }
 0x4c7   : > { %v478_v51 = vadd.f32 %v477_v50, %v2991_v31  ;;  %v2534_v52 = vpop.f32.mrb[3].mxu0  ;;  %v1082_v50 = vld [vmem:[%s3353_s4 + $0x50] sm:$0xff] }
 0x4c9   : > { %v481_v53 = vsel %vm406_vm2, %v478_v51, -inf }
 0x4ca   : > { %482 = vmax.xlane.f32.xlu1 %v481_v53 }
 0x557   : > { %v483_v54 = vpop.xlane.xlu1 %482 }
 0x558   : > { %v484_v55 = vsub.f32 %v478_v51, %v483_v54  ;;  %v1084_v51 = vld [vmem:[%s3353_s4 + $0x70] sm:$0xff] }
 0x559   : > { %v2689_v52 = vpack.c.bf16 %v1084_v51, %v1082_v50  ;;  %v2418_v50 = vld [vmem:[%s3355_s6 + $0x2] ss:$0 sm:$0xff] }
 0x55a   : > { %v485_v56 = vmul.f32 1.442695, %v484_v55 }
 0x55c   : > { %2779 = vpow2.f32 %v485_v56 }
 0x566   : > { %v2780_v57 = vpop.eup %2779 }
 0x567   : > { %v487_v58 = vsel %vm406_vm2, %v2780_v57, 0.0 }
 0x568   : > { %488 = vadd.xlane.f32.xlu1 %v487_v58 }
 0x56a   : > { %v654_v59 = vpop.f32.mrb[4].mxu0 }
 0x56b   : > { %v2544_v60 = vpop.f32.mrb[5].mxu0 }
 0x56c   : > { %v1176_v60 = vld [vmem:[%s3354_s5] sm:$0xff] }
 0x56e   : > { %v805_v61 = vpop.f32.mrb[6].mxu0 }
 0x56f   : > { %v806_v62 = vadd.f32 %v805_v61, %v2991_v31  ;;  %v2554_v63 = vpop.f32.mrb[7].mxu0  ;;  %v1177_v61 = vld [vmem:[%s3354_s5 + $0x8] sm:$0xff] }
 0x570   : > { %v2857_v63 = vmov 0.0|0.0  }
 0x571   : > { %v809_v1 = vsel %vm406_vm2, %v806_v62, -inf }
 0x572   : > { %810 = vmax.xlane.f32.xlu0 %v809_v1  ;;  %v971_v2 = vpop.f32.mrb[8].mxu0  ;;  %v2692_v1 = vpack.c.bf16 %v1177_v61, %v1176_v60 }
 0x573   : > { %v972_v3 = vadd.f32 %v971_v2, %v2991_v31  ;;  %v2564_v4 = vpop.f32.mrb[9].mxu0  ;;  %v1179_v2 = vld [vmem:[%s3354_s5 + $0x18] sm:$0xff] }
 0x574   : > { %v1180_v4 = vld [vmem:[%s3354_s5 + $0x20] sm:$0xff] }
 0x575   : > { %v975_v5 = vsel %vm406_vm2, %v972_v3, -inf }
 0x576   : > { %976 = vmax.xlane.f32.xlu0 %v975_v5  ;;  %v1181_v5 = vld [vmem:[%s3354_s5 + $0x28] sm:$0xff] }
 0x5f5   : > { %v489_v6 = vpop.xlane.xlu1 %488 }
 0x5f6   : > { %2781 = vrcp.f32 %v489_v6  ;;  %v2698_v6 = vpack.c.bf16 %v1181_v5, %v1180_v4 }
 0x5ff   : > { %v811_v7 = vpop.xlane.xlu0 %810 }
 0x600   : > { %v2782_v8 = vpop.eup %2781  ;;  %v812_v9 = vsub.f32 %v806_v62, %v811_v7  ;;  %v1178_v62 = vld [vmem:[%s3354_s5 + $0x10] sm:$0xff] }
 0x601   : > { %v491_v11 = vmul.f32 %v2782_v8, %v2780_v57  ;;  %v2414_v57 = vld [vmem:[%s3355_s6 + $0x1] ss:$0 sm:$0xff]  ;;  %v1182_v7 = vld [vmem:[%s3354_s5 + $0x30] sm:$0xff]  ;;  %v1183_v8 = vld [vmem:[%s3354_s5 + $0x38] sm:$0xff] }
 0x602   : > { %v813_v12 = vmul.f32 1.442695, %v812_v9  ;;  %v2701_v9 = vpack.c.bf16 %v1183_v8, %v1182_v7 }
 0x603   : > { %2548 = vmatmul.mubr.msk.f32.vlgmr.msra.gmra.mrb[2].mxu1 %vm406_vm2, %v491_v11  ;;  %v977_v13 = vpop.xlane.xlu0 %976  ;;  %v1184_v11 = vld [vmem:[%s3354_s5 + $0x40] sm:$0xff] }
 0x604   : > { %2783 = vpow2.f32 %v813_v12  ;;  %v978_v14 = vsub.f32 %v972_v3, %v977_v13  ;;  %2557 = vmatprep.mubr.msk.f32.mxu1 %vm2848_vm1, %v2846_v10  ;;  %v2695_v3 = vpack.c.bf16 %v1179_v2, %v1178_v62  ;;  %v1185_v12 = vld [vmem:[%s3354_s5 + $0x48] sm:$0xff] }
 0x605   : > { %v2704_v13 = vpack.c.bf16 %v1185_v12, %v1184_v11 }
 0x606   : > { %v979_v15 = vmul.f32 1.442695, %v978_v14  ;;  %v1186_v14 = vld [vmem:[%s3354_s5 + $0x50] sm:$0xff] }
 0x608   : > { %2785 = vpow2.f32 %v979_v15  ;;  %v1187_v15 = vld [vmem:[%s3354_s5 + $0x58] sm:$0xff] }
 0x60e   : > { %v2784_v16 = vpop.eup %2783 }
 0x60f   : > { %v815_v17 = vsel %vm406_vm2, %v2784_v16, 0.0 }
 0x610   : > { %816 = vadd.xlane.f32.xlu0 %v815_v17 }
 0x612   : > { %v2786_v18 = vpop.eup %2785 }
 0x613   : > { %v981_v19 = vsel %vm406_vm2, %v2786_v18, 0.0 }
 0x614   : > { %982 = vadd.xlane.f32.xlu1 %v981_v19 }
 0x625   : > { %986 = vrot.lane.b32.xlu1 %v2970_v26, %s2856_s27 }
 0x626   : > { %820 = vrot.lane.b32.xlu0 %v2970_v26, %s2847_s17 }
 0x69d   : > { %v817_v20 = vpop.xlane.xlu0 %816 }
 0x69e   : > { %2787 = vrcp.f32 %v817_v20 }
 0x6a1   : > { %v983_v21 = vpop.xlane.xlu1 %982  ;;  %v821_v22 = vpop.permute.xlu0 %820 }
 0x6a2   : > { %2789 = vrcp.f32 %v983_v21  ;;  %2556 = vmatpush3.msra.mxu1 %v821_v22 }
 0x6a3   : > { %2565 = vmatprep.subr.mxu1 %v2846_v10 }
 0x6a5   : > { %v987_v27 = vpop.permute.xlu1 %986 }
 0x6a8   : > { %v2788_v24 = vpop.eup %2787 }
 0x6a9   : > { %v819_v25 = vmul.f32 %v2788_v24, %v2784_v16  ;;  %v2707_v16 = vpack.c.bf16 %v1187_v15, %v1186_v14 }
 0x6ab   : > { %2558 = vmatmul.mubr.msk.f32.vlgmr.msra.gmra.mrb[4].mxu1 %vm406_vm2, %v819_v25 }
 0x6ac   : > { %v2790_v28 = vpop.eup %2789  ;;  %2566 = vmatpush3.msra.mxu1 %v987_v27  ;;  %2567 = vmatprep.mubr.msk.f32.mxu1 %vm2848_vm1, %v2846_v10 }
 0x6ad   : > { %v985_v29 = vmul.f32 %v2790_v28, %v2786_v18  ;;  %2691 = vmatprep.subr.bf16.mxu1 %v2857_v63 }
 0x6af   : > { %2568 = vmatmul.mubr.msk.f32.vlgmr.msra.gmra.mrb[6].mxu1 %vm406_vm2, %v985_v29 }
 0x6b0   : > { %2594 = vmatprep.mubr.msk.f32.mxu1 %vm2848_vm1, %v2846_v10  ;;  %2693 = vmatpush3.bf16.msra.mxu1 %v2692_v1 }
 0x6b1   : > { %2694 = vmatprep.subr.bf16.mxu1 %v2857_v63 }
 0x6b4   : > { %2696 = vmatpush3.bf16.msra.mxu1 %v2695_v3 }
 0x6b5   : > { %2697 = vmatprep.subr.bf16.mxu1 %v2857_v63 }
 0x6b8   : > { %2699 = vmatpush3.bf16.msra.mxu1 %v2698_v6 }
 0x6b9   : > { %2700 = vmatprep.subr.bf16.mxu1 %v2857_v63 }
 0x6bc   : > { %2702 = vmatpush3.bf16.msra.mxu1 %v2701_v9 }
 0x6bd   : > { %2703 = vmatprep.subr.bf16.mxu1 %v2857_v63 }
 0x6c0   : > { %2705 = vmatpush3.bf16.msra.mxu1 %v2704_v13 }
 0x6c1   : > { %2706 = vmatprep.subr.bf16.mxu1 %v2857_v63 }
 0x6c4   : > { %2708 = vmatpush3.bf16.msra.mxu1 %v2707_v16 }
 0x6c5   : > { %2612 = vmatprep.subr.mxu1 %v2846_v10 }
 0x6d6   : > { %v727_v26 = vpop.f32.mrb[2].mxu1 }
 0x6d7   : > { %v728_v30 = vadd.f32 %v727_v26, %v654_v59  ;;  %v2549_v32 = vpop.f32.mrb[3].mxu1 }
 0x77e   : > { %v892_v33 = vpop.f32.mrb[4].mxu1 }
 0x77f   : > { %v896_v34 = vadd.f32 %v892_v33, %v728_v30  ;;  %v2559_v35 = vpop.f32.mrb[5].mxu1 }
 0x780   : > { %v2420_v35 = vld [vmem:[%s3353_s4 + $0x88] sm:$0xff] }
 0x782   : > { %v1058_v36 = vpop.f32.mrb[6].mxu1 }
 0x783   : > { %v1062_v37 = vadd.f32 %v1058_v36, %v896_v34  ;;  %v2569_v38 = vpop.f32.mrb[7].mxu1  ;;  %v2422_v36 = vld [vmem:[%s3353_s4 + $0xa8] sm:$0xff] }
 0x784   : > { %v2419_v38 = vld [vmem:[%s3353_s4 + $0x80] sm:$0xff] }
 0x785   : > { %v3044_v39 = vadd.f32 %v1062_v37, %v2927_v0  ;;  %v1078_v0 = vld [vmem:[%s3353_s4 + $0x10] sm:$0xff]  ;;  %v2709_v37 = vpack.c.bf16 %v2422_v36, %v2420_v35 }
 0x786   : > { %v2685_v46 = vpack.c.bf16 %v1080_v45, %v1078_v0  ;;  %v2425_v0 = vld [vmem:[%s3353_s4 + $0xe0] sm:$0xff] }
 0x787   : > { %v1065_v40 = vmul.f32 %v3044_v39, %v3044_v39  ;;  %v2715_v45 = vpack.c.bf16 %v2425_v0, %v2423_v44 }
 0x788   : > { %2686 = vmatpush1.bf16.msra.mxu0 %v2685_v46 }
 0x789   : > { %v1066_v41 = vsel %vm301_vm0, %v1065_v40, 0.0  ;;  %2688 = vmatprep.subr.bf16.mxu0 %v2687_v49 }
 0x78a   : > { %1067 = vadd.xlane.f32.xlu1 %v1066_v41  ;;  %v2424_v41 = vld [vmem:[%s3353_s4 + $0xc8] sm:$0xff] }
 0x78b   : > { %v2713_v43 = vpack.c.bf16 %v2426_v42, %v2424_v41 }
 0x78c   : > { %2690 = vmatpush1.bf16.msra.mxu0 %v2689_v52 }
 0x78d   : > { %2710 = vmatprep.subr.bf16.mxu0 %v2709_v37 }
 0x817   : > { %v1068_v53 = vpop.xlane.xlu1 %1067 }
 0x818   : > { %v1069_v54 = vmul.f32 0.03125, %v1068_v53 }
 0x81a   : > { %v1070_v55 = vadd.f32 1e-06, %v1069_v54 }
 0x81c   : > { %2791 = vrsqrt.f32 %v1070_v55 }
 0x826   : > { %v2792_v56 = vpop.eup %2791 }
 0x827   : > { %v1072_v58 = vmul.f32 %v2792_v56, %v3044_v39 }
 0x829   : > { %v1077_v59 = vmul.f32 %v2414_v57, %v1072_v58 }
 0x82b   : > { %2415 = vmatmul.mubr.msk.f32.vlgmr.msra.gmra.mrb[10].mxu0 %vm301_vm0, %v1077_v59 }
 0x82c   : > { %1353 = vmatprep.mubr.f32.mxu0 %v2846_v10 }
 0x8fe   : > { %v1155_v17 = vpop.f32.mrb[10].mxu0 }
 0x8ff   : > { %1169 = vrot.lane.b32.xlu0 %v1155_v17, %s2856_s27  ;;  %v1157_v18 = vpop.f32.mrb[11].mxu0  ;;  %v2416_v19 = vmul.f32 -1.442695, %v1155_v17 }
 0x901   : > { %2793 = vpow2.f32 %v2416_v19 }
 0x903   : > { %1171 = vrot.lane.b32.xlu0 %v1157_v18, %s2856_s27 }
 0x90b   : > { %v2794_v20 = vpop.eup %2793 }
 0x90c   : > { %v1163_v21 = vadd.f32 1.0, %v2794_v20 }
 0x90e   : > { %2795 = vrcp.f32 %v1163_v21 }
 0x918   : > { %v2796_v24 = vpop.eup %2795 }
 0x919   : > { %v1166_v25 = vmul.f32 %v2796_v24, %v1155_v17 }
 0x971   : > { %v1170_v22 = vpop.permute.xlu0 %1169 }
 0x975   : > { %v1172_v27 = vpop.permute.xlu0 %1171 }
 0x976   : > { %v1173_v28 = vsel %vm301_vm0, %v1170_v22, %v1172_v27 }
 0x977   : > { %v1175_v29 = vmul.f32 %v1173_v28, %v1166_v25 }
 0x979   : > { %2595 = vmatmul.mubr.msk.f32.vlgmr.msra.gmra.mrb[8].mxu1 %vm1188_vm3, %v1175_v29 }
 0x97a   : > { %2614 = vmatprep.mubr.msk.f32.mxu1 %vm2848_vm1, %v2846_v10 }
 0xa4c   : > { %v1258_v26 = vpop.f32.mrb[8].mxu1 }
 0xa4d   : > { %v3129_v30 = vadd.f32 %v1258_v26, %v3044_v39  ;;  %v2596_v32 = vpop.f32.mrb[9].mxu1  ;;  %v2421_v39 = vld [vmem:[%s3353_s4 + $0xa0] sm:$0xff] }
 0xa4e   : > { %v2711_v40 = vpack.c.bf16 %v2421_v39, %v2419_v38 }
 0xa4f   : > { %v1264_v33 = vmul.f32 %v3129_v30, %v3129_v30 }
 0xa50   : > { %2712 = vmatpush1.bf16.msra.mxu0 %v2711_v40 }
 0xa51   : > { %v1265_v34 = vsel %vm301_vm0, %v1264_v33, 0.0  ;;  %2714 = vmatprep.subr.bf16.mxu0 %v2713_v43 }
 0xa52   : > { %1266 = vadd.xlane.f32.xlu0 %v1265_v34 }
 0xa54   : > { %2716 = vmatpush1.bf16.msra.mxu0 %v2715_v45 }
 0xa55   : > { %2597 = vmatprep.subr.mxu0 %v2846_v10 }
 0xadf   : > { %v1267_v46 = vpop.xlane.xlu0 %1266 }
 0xae0   : > { %v1268_v47 = vmul.f32 0.03125, %v1267_v46 }
 0xae2   : > { %v1269_v48 = vadd.f32 1e-06, %v1268_v47 }
 0xae4   : > { %2797 = vrsqrt.f32 %v1269_v48 }
 0xaee   : > { %v2798_v49 = vpop.eup %2797 }
 0xaef   : > { %v1271_v51 = vmul.f32 %v2798_v49, %v3129_v30 }
 0xaf1   : > { %v1276_v52 = vmul.f32 %v2418_v50, %v1271_v51 }
 0xaf3   : > { %2427 = vmatmul.mubr.msk.f32.vlgmr.msra.gmra.mrb[12].mxu0 %vm301_vm0, %v1276_v52 }
 0xaf4   : > { %2599 = vmatprep.mubr.msk.f32.mxu0 %vm2848_vm1, %v2846_v10 }
 0xbc6   : > { %v1355_v53 = vpop.f32.mrb[12].mxu0 }
 0xbc7   : > { %v1360_v54 = vmul.f32 %v1355_v53, %v2967_v23  ;;  %v3167_v55 = vpop.f32.mrb[13].mxu0 }
 0xbc8   : > { %2613 = vmatpush3.msra.mxu1 %v3167_v55 }
 0xbc9   : > { %1362 = vrot.lane.b32.xlu1 %v1360_v54, %s2847_s17  ;;  %2622 = vmatprep.subr.mxu1 %v2846_v10 }
 0xc3b   : > { %v1363_v56 = vpop.permute.xlu1 %1362 }
 0xc3c   : > { %v1365_v57 = vadd.f32 %v1363_v56, %v1360_v54 }
 0xc3e   : > { %1456 = vrot.lane.b32.xlu1 %v1365_v57, %s2849_s18  ;;  %1367 = vrot.lane.b32.xlu0 %v1365_v57, %s2851_s23 }
 0xc42   : > { %1454 = vrot.lane.b32.xlu1 %v1365_v57, %s2850_s19 }
 0xcb0   : > { %v1368_v58 = vpop.permute.xlu0 %1367  ;;  %v1457_v59 = vpop.permute.xlu1 %1456 }
 0xcb1   : > { %2598 = vmatpush3.xpose.msk.msra.mxu0 %vm406_vm2, %v1368_v58 }
 0xcb2   : > { %2602 = vmatprep.subr.mxu0 %v2846_v10 }
 0xcb4   : > { %2600 = vmatmul.mubr.msk.f32.vlgmr.msra.gmra.mrb[14].mxu0 %vm406_vm2, %v1365_v57  ;;  %v1455_v23 = vpop.permute.xlu1 %1454 }
 0xcb5   : > { %2603 = vmatpush3.xpose.msk.msra.mxu0 %vm406_vm2, %v1457_v59  ;;  %2604 = vmatprep.mubr.msk.f32.mxu0 %vm2848_vm1, %v2846_v10 }
 0xcb6   : > { %2607 = vmatprep.subr.mxu0 %v2846_v10 }
 0xcb8   : > { %2605 = vmatmul.mubr.msk.f32.vlgmr.msra.gmra.mrb[16].mxu0 %vm406_vm2, %v1455_v23 }
 0xcb9   : > { %2609 = vmatprep.mubr.msk.f32.mxu0 %vm2848_vm1, %v2846_v10 }
 0xd87   : > { %v1439_v60 = vpop.f32.mrb[14].mxu0 }
 0xd88   : > { %v2601_v61 = vpop.f32.mrb[15].mxu0  ;;  %v1440_v9 = vadd.f32 %v1439_v60, %v2991_v31 }
 0xd8a   : > { %v1443_v11 = vsel %vm406_vm2, %v1440_v9, -inf }
 0xd8b   : > { %v1528_v62 = vpop.f32.mrb[16].mxu0 }
 0xd8c   : > { %v1529_v1 = vadd.f32 %v1528_v62, %v2991_v31  ;;  %v2606_v2 = vpop.f32.mrb[17].mxu0 }
 0xd8e   : > { %v1532_v3 = vsel %vm406_vm2, %v1529_v1, -inf }
 0xd8f   : > { %1533 = vmax.xlane.f32.xlu1 %v1532_v3 }
 0xda0   : > { %1695 = vrot.lane.b32.xlu1 %v1365_v57, %s2852_s24  ;;  %s2226_s24 = sld [smem:[#allocation4 + %s2913_s0]] }
 0xda4   : > { %1693 = vrot.lane.b32.xlu1 %v1365_v57, %s2853_s25 }
 0xda8   : > { %1859 = vrot.lane.b32.xlu1 %v1365_v57, %s2855_s12 }
 0xe1c   : > { %v1534_v4 = vpop.xlane.xlu1 %1533 }
 0xe1d   : > { %v1535_v5 = vsub.f32 %v1529_v1, %v1534_v4 }
 0xe1f   : > { %v1536_v6 = vmul.f32 1.442695, %v1535_v5 }
 0xe20   : > { %v1696_v14 = vpop.permute.xlu1 %1695 }
 0xe21   : > { %2799 = vpow2.f32 %v1536_v6  ;;  %v2442_v6 = vld [vmem:[%s3353_s4 + $0x98] sm:$0xff] }
 0xe24   : > { %v1694_v17 = vpop.permute.xlu1 %1693 }
 0xe28   : > { %v1860_v19 = vpop.permute.xlu1 %1859 }
 0xe2b   : > { %v2800_v7 = vpop.eup %2799 }
 0xe2c   : > { %v1538_v8 = vsel %vm406_vm2, %v2800_v7, 0.0 }
 0xe2d   : > { %1539 = vadd.xlane.f32.xlu0 %v1538_v8 }
 0xe43   : > { %1544 = vrot.lane.b32.xlu0 %v3167_v55, %s2851_s23  ;;  %s295_s23 = scalar_lea.vmem %s3357_s8, %s2919_s11 }
 0xe47   : > { %1861 = vrot.lane.b32.xlu0 %v1365_v57, %s2854_s26 }
 0xe66   : > { %1444 = vmax.xlane.f32.xlu0 %v1443_v11 }
 0xeba   : > { %v1540_v12 = vpop.xlane.xlu0 %1539 }
 0xebb   : > { %2801 = vrcp.f32 %v1540_v12  ;;  %v2446_v12 = vld [vmem:[%s3353_s4 + $0xd8] sm:$0xff] }
 0xebe   : > { %v1545_v13 = vpop.permute.xlu0 %1544 }
 0xebf   : > { %2608 = vmatpush3.msra.mxu0 %v1545_v13  ;;  %v2448_v13 = vld [vmem:[%s3353_s4 + $0xf8] sm:$0xff] }
 0xec0   : > { %2617 = vmatprep.subr.mxu0 %v2846_v10 }
 0xec2   : > { %v1862_v18 = vpop.permute.xlu0 %1861 }
 0xec5   : > { %v2802_v15 = vpop.eup %2801 }
 0xec6   : > { %v1542_v16 = vmul.f32 %v2802_v15, %v2800_v7  ;;  %v2444_v7 = vld [vmem:[%s3353_s4 + $0xb8] sm:$0xff]  ;;  %v2445_v15 = vld [vmem:[%s3353_s4 + $0xd0] sm:$0xff] }
 0xec7   : > { %v2717_v8 = vpack.c.bf16 %v2444_v7, %v2442_v6  ;;  %v2229_v7 = vld [vmem:[%s3355_s6 + $0x4] sm:$0x1] }
 0xec8   : > { %2610 = vmatmul.mubr.msk.f32.vlgmr.msra.gmra.mrb[18].mxu0 %vm406_vm2, %v1542_v16  ;;  %v2447_v16 = vld [vmem:[%s3353_s4 + $0xf0] sm:$0xff] }
 0xec9   : > { %2618 = vmatpush3.xpose.msk.msra.mxu0 %vm406_vm2, %v1696_v14  ;;  %2619 = vmatprep.mubr.msk.f32.mxu0 %vm2848_vm1, %v2846_v10  ;;  %v2721_v14 = vpack.c.bf16 %v2448_v13, %v2446_v12  ;;  %v2319_v13 = vld [vmem:[%s3356_s7 + $0x21] sm:$0x1] }
 0xeca   : > { %2627 = vmatprep.subr.mxu0 %v2846_v10 }
 0xecc   : > { %2620 = vmatmul.mubr.msk.f32.vlgmr.msra.gmra.mrb[20].mxu0 %vm406_vm2, %v1694_v17  ;;  %v2723_v17 = vpack.c.bf16 %v2447_v16, %v2445_v15 }
 0xecd   : > { %2628 = vmatpush3.xpose.msk.msra.mxu0 %vm406_vm2, %v1862_v18  ;;  %2629 = vmatprep.mubr.msk.f32.mxu0 %vm2848_vm1, %v2846_v10 }
 0xece   : > { %2718 = vmatprep.subr.bf16.mxu0 %v2717_v8 }
 0xed0   : > { %2630 = vmatmul.mubr.msk.f32.vlgmr.msra.gmra.mrb[22].mxu0 %vm406_vm2, %v1860_v19 }
 0xed1   : > { %2115 = vmatprep.mubr.f32.mxu0 %v2846_v10 }
 0xef3   : > { %v1445_v20 = vpop.xlane.xlu0 %1444 }
 0xef4   : > { %v1446_v21 = vsub.f32 %v1440_v9, %v1445_v20  ;;  %v2443_v9 = vld [vmem:[%s3353_s4 + $0xb0] sm:$0xff] }
 0xef6   : > { %v1447_v22 = vmul.f32 1.442695, %v1446_v21 }
 0xef8   : > { %2803 = vpow2.f32 %v1447_v22  ;;  %v2440_v22 = vld [vmem:[%s3355_s6 + $0x3] ss:$0 sm:$0xff] }
 0xf02   : > { %v2804_v36 = vpop.eup %2803 }
 0xf03   : > { %v1449_v37 = vsel %vm406_vm2, %v2804_v36, 0.0 }
 0xf9b   : > { %v1616_v24 = vpop.f32.mrb[18].mxu0 }
 0xf9c   : > { %v2611_v25 = vpop.f32.mrb[19].mxu0 }
 0xf9f   : > { %v1767_v27 = vpop.f32.mrb[20].mxu0 }
 0xfa0   : > { %v1768_v28 = vadd.f32 %v1767_v27, %v2991_v31  ;;  %v2621_v29 = vpop.f32.mrb[21].mxu0  ;;  %v2451_v27 = vld [vmem:[%s3354_s5 + $0x60] sm:$0xff] }
 0xfa1   : > { %v2453_v29 = vld [vmem:[%s3354_s5 + $0x70] sm:$0xff] }
 0xfa2   : > { %v1771_v26 = vsel %vm406_vm2, %v1768_v28, -inf }
 0xfa3   : > { %1772 = vmax.xlane.f32.xlu1 %v1771_v26  ;;  %v1933_v32 = vpop.f32.mrb[22].mxu0 }
 0xfa4   : > { %v1934_v33 = vadd.f32 %v1933_v32, %v2991_v31  ;;  %v2631_v34 = vpop.f32.mrb[23].mxu0  ;;  %v2454_v32 = vld [vmem:[%s3354_s5 + $0x78] sm:$0xff] }
 0xfa5   : > { %v2456_v34 = vld [vmem:[%s3354_s5 + $0x88] sm:$0xff] }
 0xfa6   : > { %v1937_v35 = vsel %vm406_vm2, %v1934_v33, -inf }
 0xfa7   : > { %1938 = vmax.xlane.f32.xlu0 %v1937_v35 }
 0xfab   : > { %1450 = vadd.xlane.f32.xlu0 %v1449_v37  ;;  %v2458_v37 = vld [vmem:[%s3354_s5 + $0x98] sm:$0xff] }
0x1030   : > { %v1773_v38 = vpop.xlane.xlu1 %1772 }
0x1031   : > { %v1774_v39 = vsub.f32 %v1768_v28, %v1773_v38  ;;  %v2452_v28 = vld [vmem:[%s3354_s5 + $0x68] sm:$0xff] }
0x1032   : > { %v2726_v26 = vpack.c.bf16 %v2452_v28, %v2451_v27 }
0x1033   : > { %v1775_v40 = vmul.f32 1.442695, %v1774_v39  ;;  %v2459_v39 = vld [vmem:[%s3354_s5 + $0xa0] sm:$0xff] }
0x1034   : > { %v1939_v41 = vpop.xlane.xlu0 %1938 }
0x1035   : > { %2805 = vpow2.f32 %v1775_v40  ;;  %v1940_v42 = vsub.f32 %v1934_v33, %v1939_v41  ;;  %v2729_v33 = vpack.c.bf16 %v2454_v32, %v2453_v29  ;;  %v2460_v40 = vld [vmem:[%s3354_s5 + $0xa8] sm:$0xff] }
0x1036   : > { %v2738_v41 = vpack.c.bf16 %v2460_v40, %v2459_v39 }
0x1037   : > { %v1941_v43 = vmul.f32 1.442695, %v1940_v42  ;;  %v2461_v42 = vld [vmem:[%s3354_s5 + $0xb0] sm:$0xff] }
0x1038   : > { %v1451_v44 = vpop.xlane.xlu0 %1450 }
0x1039   : > { %2807 = vpow2.f32 %v1941_v43  ;;  %v2462_v43 = vld [vmem:[%s3354_s5 + $0xb8] sm:$0xff] }
0x103a   : > { %2809 = vrcp.f32 %v1451_v44  ;;  %v2741_v44 = vpack.c.bf16 %v2462_v43, %v2461_v42 }
0x103f   : > { %v2806_v0 = vpop.eup %2805 }
0x1040   : > { %v1777_v31 = vsel %vm406_vm2, %v2806_v0, 0.0 }
0x1041   : > { %1778 = vadd.xlane.f32.xlu1 %v1777_v31 }
0x1043   : > { %v2808_v45 = vpop.eup %2807 }
0x1044   : > { %v2810_v46 = vpop.eup %2809  ;;  %v1943_v47 = vsel %vm406_vm2, %v2808_v45, 0.0 }
0x1045   : > { %v1453_v48 = vmul.f32 %v2810_v46, %v2804_v36  ;;  %1944 = vadd.xlane.f32.xlu0 %v1943_v47  ;;  %v2457_v36 = vld [vmem:[%s3354_s5 + $0x90] sm:$0xff] }
0x1046   : > { %v2735_v38 = vpack.c.bf16 %v2458_v37, %v2457_v36 }
0x1047   : > { %2615 = vmatmul.mubr.msk.f32.vlgmr.msra.gmra.mrb[10].mxu1 %vm406_vm2, %v1453_v48 }
0x1048   : > { %2624 = vmatprep.mubr.msk.f32.mxu1 %vm2848_vm1, %v2846_v10 }
0x1052   : > { %1782 = vrot.lane.b32.xlu1 %v3167_v55, %s2847_s17 }
0x105b   : > { %1948 = vrot.lane.b32.xlu0 %v3167_v55, %s2856_s27 }
0x10ce   : > { %v1779_v49 = vpop.xlane.xlu1 %1778 }
0x10cf   : > { %2811 = vrcp.f32 %v1779_v49 }
0x10d2   : > { %v1783_v50 = vpop.permute.xlu1 %1782  ;;  %v1945_v51 = vpop.xlane.xlu0 %1944 }
0x10d3   : > { %2813 = vrcp.f32 %v1945_v51  ;;  %2623 = vmatpush3.msra.mxu1 %v1783_v50 }
0x10d4   : > { %2632 = vmatprep.subr.mxu1 %v2846_v10 }
0x10d6   : > { %v1949_v54 = vpop.permute.xlu0 %1948 }
0x10d9   : > { %v2812_v52 = vpop.eup %2811 }
0x10da   : > { %v1781_v53 = vmul.f32 %v2812_v52, %v2806_v0 }
0x10dc   : > { %2625 = vmatmul.mubr.msk.f32.vlgmr.msra.gmra.mrb[12].mxu1 %vm406_vm2, %v1781_v53 }
0x10dd   : > { %v2814_v56 = vpop.eup %2813  ;;  %2633 = vmatpush3.msra.mxu1 %v1949_v54  ;;  %2634 = vmatprep.mubr.msk.f32.mxu1 %vm2848_vm1, %v2846_v10 }
0x10de   : > { %v1947_v57 = vmul.f32 %v2814_v56, %v2808_v45  ;;  %2725 = vmatprep.subr.bf16.mxu1 %v2857_v63 }
0x10e0   : > { %2635 = vmatmul.mubr.msk.f32.vlgmr.msra.gmra.mrb[14].mxu1 %vm406_vm2, %v1947_v57 }
0x10e1   : > { %2661 = vmatprep.mubr.msk.f32.mxu1 %vm2848_vm1, %v2846_v10  ;;  %2727 = vmatpush3.bf16.msra.mxu1 %v2726_v26 }
0x10e2   : > { %2728 = vmatprep.subr.bf16.mxu1 %v2857_v63 }
0x10e5   : > { %2730 = vmatpush3.bf16.msra.mxu1 %v2729_v33 }
0x10e6   : > { %2731 = vmatprep.subr.bf16.mxu1 %v2857_v63 }
0x111a   : > { %v1689_v55 = vpop.f32.mrb[10].mxu1 }
0x111b   : > { %v1690_v58 = vadd.f32 %v1689_v55, %v1616_v24  ;;  %v2616_v59 = vpop.f32.mrb[11].mxu1 }
0x11af   : > { %v1854_v23 = vpop.f32.mrb[12].mxu1 }
0x11b0   : > { %v1858_v60 = vadd.f32 %v1854_v23, %v1690_v58  ;;  %v2626_v61 = vpop.f32.mrb[13].mxu1  ;;  %v2240_v23 = vld [vmem:[%s3356_s7] sm:$0xff] }
0x11b3   : > { %v2020_v62 = vpop.f32.mrb[14].mxu1 }
0x11b4   : > { %v2024_v1 = vadd.f32 %v2020_v62, %v1858_v60  ;;  %v2636_v2 = vpop.f32.mrb[15].mxu1  ;;  %v2241_v60 = vld [vmem:[%s3356_s7 + $0x8] sm:$0xff]  ;;  %v2242_v62 = vld [vmem:[%s3356_s7 + $0x10] sm:$0xff] }
0x11b5   : > { %v2744_v61 = vpack.c.bf16 %v2241_v60, %v2240_v23 }
0x11b6   : > { %v3231_v3 = vadd.f32 %v2024_v1, %v3129_v30  ;;  %v2441_v30 = vld [vmem:[%s3353_s4 + $0x90] sm:$0xff]  ;;  %v2243_v1 = vld [vmem:[%s3356_s7 + $0x18] sm:$0xff] }
0x11b7   : > { %v2719_v11 = vpack.c.bf16 %v2443_v9, %v2441_v30  ;;  %v2747_v2 = vpack.c.bf16 %v2243_v1, %v2242_v62  ;;  %v2244_v30 = vld [vmem:[%s3356_s7 + $0x20] sm:$0x1] }
0x11b8   : > { %v2027_v4 = vmul.f32 %v3231_v3, %v3231_v3 }
0x11b9   : > { %2720 = vmatpush1.bf16.msra.mxu0 %v2719_v11 }
0x11ba   : > { %v2028_v5 = vsel %vm301_vm0, %v2027_v4, 0.0  ;;  %2722 = vmatprep.subr.bf16.mxu0 %v2721_v14 }
0x11bb   : > { %2029 = vadd.xlane.f32.xlu1 %v2028_v5 }
0x11bd   : > { %2724 = vmatpush1.bf16.msra.mxu0 %v2723_v17  ;;  %v2858_v17 = vmov 0  }
0x11be   : > { %2743 = vmatprep.subr.bf16.mxu0 %v2857_v63  ;;  %2771 = vset.pattern.permute.xlu1 %v2858_v17 }
0x11bf   : > { %2772 = vset.pattern.permute.xlu0 %v2858_v17 }
0x1248   : > { %v2030_v18 = vpop.xlane.xlu1 %2029 }
0x1249   : > { %v2031_v19 = vmul.f32 0.03125, %v2030_v18  ;;  %v2325_v18 = vld [vmem:[%s3356_s7 + $0x22] sm:$0x1] }
0x124b   : > { %v2032_v20 = vadd.f32 1e-06, %v2031_v19 }
0x124d   : > { %2815 = vrsqrt.f32 %v2032_v20 }
0x1257   : > { %v2816_v21 = vpop.eup %2815 }
0x1258   : > { %v2034_v24 = vmul.f32 %v2816_v21, %v3231_v3 }
0x125a   : > { %v2039_v25 = vmul.f32 %v2440_v22, %v2034_v24 }
0x125c   : > { %2449 = vmatmul.mubr.msk.f32.vlgmr.msra.gmra.mrb[24].mxu0 %vm301_vm0, %v2039_v25 }
0x125d   : > { %2672 = vmatprep.mubr.msk.f32.mxu0 %vm2848_vm1, %v2846_v10  ;;  %v2455_v10 = vld [vmem:[%s3354_s5 + $0x80] sm:$0xff]  ;;  %2745 = vmatpush3.bf16.msra.mxu0 %v2744_v61 }
0x125e   : > { %v2732_v35 = vpack.c.bf16 %v2456_v34, %v2455_v10  ;;  %2746 = vmatprep.subr.bf16.mxu0 %v2857_v63 }
0x1260   : > { %2733 = vmatpush3.bf16.msra.mxu1 %v2732_v35 }
0x1261   : > { %2734 = vmatprep.subr.bf16.mxu1 %v2857_v63  ;;  %2748 = vmatpush3.bf16.msra.mxu0 %v2747_v2 }
0x1264   : > { %2736 = vmatpush3.bf16.msra.mxu1 %v2735_v38 }
0x1265   : > { %2737 = vmatprep.subr.bf16.mxu1 %v2857_v63 }
0x1268   : > { %2739 = vmatpush3.bf16.msra.mxu1 %v2738_v41 }
0x1269   : > { %2740 = vmatprep.subr.bf16.mxu1 %v2857_v63 }
0x126c   : > { %2742 = vmatpush3.bf16.msra.mxu1 %v2741_v44 }
0x132f   : > { %v2117_v0 = vpop.f32.mrb[24].mxu0 }
0x1330   : > { %2131 = vrot.lane.b32.xlu0 %v2117_v0, %s2856_s27  ;;  %v2119_v31 = vpop.f32.mrb[25].mxu0  ;;  %v2450_v45 = vmul.f32 -1.442695, %v2117_v0 }
0x1332   : > { %2817 = vpow2.f32 %v2450_v45 }
0x1334   : > { %2133 = vrot.lane.b32.xlu0 %v2119_v31, %s2856_s27  ;;  %s2227_s27 = scalar_lea.vmem [#allocation2], %s2226_s24 }
0x133c   : > { %v2818_v46 = vpop.eup %2817 }
0x133d   : > { %v2125_v47 = vadd.f32 1.0, %v2818_v46 }
0x133f   : > { %2819 = vrcp.f32 %v2125_v47 }
0x1349   : > { %v2820_v49 = vpop.eup %2819 }
0x134a   : > { %v2128_v50 = vmul.f32 %v2820_v49, %v2117_v0 }
0x13a2   : > { %v2132_v48 = vpop.permute.xlu0 %2131 }
0x13a6   : > { %v2134_v51 = vpop.permute.xlu0 %2133 }
0x13a7   : > { %v2135_v52 = vsel %vm301_vm0, %v2132_v48, %v2134_v51 }
0x13a8   : > { %v2137_v53 = vmul.f32 %v2135_v52, %v2128_v50 }
0x13aa   : > { %2662 = vmatmul.mubr.msk.f32.vlgmr.msra.gmra.mrb[16].mxu1 %vm1188_vm3, %v2137_v53 }
0x147d   : > { %v2220_v54 = vpop.f32.mrb[16].mxu1 }
0x147e   : > { %v2224_v56 = vadd.f32 %v2220_v54, %v3231_v3  ;;  %v2663_v57 = vpop.f32.mrb[17].mxu1 }
0x1480   : > { %2225 = vst.msk [vmem:[#allocation2] sm:$0xff] %vm301_vm0, %v2224_v56 }
0x1487   : > { %v2228_v55 = vld [vmem:[%s2227_s27] sm:$0x1] }
0x1488   : > { %v2230_v58 = vmul.f32 %v2228_v55, %v2228_v55 }
0x148a   : > { %v2232_v59 = vsel %vm2231_vm4, %v2230_v58, 0.0 }
0x148b   : > { %2233 = vadd.xlane.f32.xlu0 %v2232_v59 }
0x1518   : > { %v2234_v3 = vpop.xlane.xlu0 %2233 }
0x1519   : > { %v2235_v4 = vmul.f32 0.03125, %v2234_v3 }
0x151b   : > { %v2236_v5 = vadd.f32 1e-06, %v2235_v4 }
0x151d   : > { %2821 = vrsqrt.f32 %v2236_v5 }
0x1527   : > { %v2822_v6 = vpop.eup %2821 }
0x1528   : > { %v2238_v63 = vmul.f32 %v2822_v6, %v2228_v55 }
0x152a   : > { %v2239_v8 = vmul.f32 %v2238_v63, %v2229_v7 }
0x152c   : > { %2673 = vmatmul.mubr.msk.f32.vlgmr.msra.gmra.mrb[26].mxu0 %vm301_vm0, %v2239_v8 }
0x15ff   : > { %v2314_v9 = vpop.f32.mrb[26].mxu0 }
0x1600   : > { %v2315_v11 = vadd.f32 %v2314_v9, %v2244_v30  ;;  %v2674_v12 = vpop.f32.mrb[27].mxu0 }
0x1602   : > { %v2318_v14 = vmax.f32 %v2315_v11, 0.0 }
0x1604   : > { %v2320_v15 = vmul.f32 %v2319_v13, %v2318_v14 }
0x1606   : > { %v2322_v16 = vsel %vm2321_vm5, %v2320_v15, 0.0 }
0x1607   : > { %2323 = vadd.xlane.f32.xlu1 %v2322_v16 }
0x1694   : > { %v2324_v19 = vpop.xlane.xlu1 %2323 }
0x1695   : > { %v2326_v20 = vadd.f32 %v2325_v18, %v2324_v19 }
0x1697   : > { %2329 = vperm.xlu1 %2771, %v2326_v20  }
0x1716   : > { %v2330_v21 = vpop.permute.xlu1 %2329 }
0x1717   : > { %2332 = vst [vmem:[%s295_s23] sm:$0x1] %v2330_v21 }
0x1718 PF: > { %s24_s10 = sadd.s32 1, %s2843_s10  }
0x1719   : > { %p21_p9 = scmp.ge.s32.totalorder %s24_s10, 4  }
0x171b   :  { %23 = sbr.rel (!%p21_p9) target bundleno = 16 (0x10), region = 84 }

</bundles_post_ra>
